<compile_context>
chip_gen: v6e
topology: v6e:2x2x1
jax: 0.10.0
libtpu: 0.0.40
codegen_flags: <defaults>
</compile_context>

<pallas_src>
from functools import partial

import jax
import jax.numpy as jnp
from jax.experimental import pallas as pl
from jax.experimental.pallas import tpu as pltpu


# ---------------------------------------------------------------------------
# Kernels
# ---------------------------------------------------------------------------

def _relation_kernel(a_ref, dinv_ref, xk_ref, xt_ref, w_ref, b_ref, hmean_ref,
                     cat_ref, agg_ref, acc_ref, *, f_pad):
    """Grid (row tile i, relation r, k tile k):
       acc += relu([deg_inv * (A_r @ X) | X] @ [W_l ; W_r]/R + b/R)."""
    r = pl.program_id(1)
    k = pl.program_id(2)
    nr = pl.num_programs(1)
    nk = pl.num_programs(2)

    @pl.when((r == 0) & (k == 0))
    def _():
        acc_ref[...] = jnp.zeros_like(acc_ref)
        # x row tile depends only on i -> copy into the concat scratch once per tile.
        cat_ref[:, f_pad:] = xt_ref[...]

    @pl.when(k == 0)
    def _():
        agg_ref[...] = jnp.zeros_like(agg_ref)

    # un-normalized int8 adjacency tile -> bf16 (VPU cast), MXU contraction, f32 acc.
    agg_ref[...] += jnp.dot(a_ref[...].astype(jnp.bfloat16), xk_ref[...],
                            preferred_element_type=jnp.float32)

    @pl.when(k == nk - 1)
    def _():
        # per-row mean: f32 deg_inv applied once after the full K contraction.
        cat_ref[:, :f_pad] = (agg_ref[...] * dinv_ref[...]).astype(cat_ref.dtype)
        # fused single MXU pass: [agg | x_tile] @ [W_l ; W_r]  (1/R already folded in)
        h = jnp.dot(cat_ref[...], w_ref[...],
                    preferred_element_type=jnp.float32) + b_ref[...]
        acc_ref[...] += jnp.maximum(h, 0.0)

        @pl.when(r == nr - 1)
        def _():
            hmean_ref[...] = acc_ref[...].astype(hmean_ref.dtype)


def _final_kernel(a_ref, dinv_ref, hk_ref, ht_ref, w_ref, b_ref, o_ref,
                  cat_ref, agg_ref, *, h_pad):
    """Final SAGEConv (no ReLU).  Grid (row tile i, k tile k)."""
    k = pl.program_id(1)
    nk = pl.num_programs(1)

    @pl.when(k == 0)
    def _():
        agg_ref[...] = jnp.zeros_like(agg_ref)
        cat_ref[:, h_pad:] = ht_ref[...]

    agg_ref[...] += jnp.dot(a_ref[...].astype(jnp.bfloat16), hk_ref[...],
                            preferred_element_type=jnp.float32)

    @pl.when(k == nk - 1)
    def _():
        cat_ref[:, :h_pad] = (agg_ref[...] * dinv_ref[...]).astype(cat_ref.dtype)
        o_ref[...] = (jnp.dot(cat_ref[...], w_ref[...],
                              preferred_element_type=jnp.float32) + b_ref[...])


# ---------------------------------------------------------------------------
# Glue / wrapper
# ---------------------------------------------------------------------------

def _round_up(x, m):
    return (x + m - 1) // m * m


def _vmem_limit_bytes():
    # Per-generation VMEM budget: ~80% of physical (v5e/v6e: 128 MiB, v7x: 64 MiB/TC).
    try:
        cap = int(pltpu.get_tpu_info().vmem_capacity_bytes)
    except Exception:
        cap = 64 * 1024 * 1024
    return int(min(cap * 0.8, 112 * 1024 * 1024))


def build_adjacency(edge_index, n_pad):
    """Un-normalized int8 edge-count adjacency A[dst, src] + f32 per-row inverse degree."""
    src, dst = edge_index[0], edge_index[1]
    # TODO(synk): int8 counts overflow if one (dst, src) pair repeats > 127 times.
    a = jnp.zeros((n_pad, n_pad), jnp.int8).at[dst, src].add(1)
    deg = a.sum(axis=1, dtype=jnp.float32)
    dinv = (1.0 / jnp.maximum(deg, 1.0)).reshape(n_pad, 1)   # rows with deg=0 aggregate to 0
    return a, dinv


def mux_gnn_forward(x, edge_indices, params, *, tm=256, tk=2048, lane=128):
    N, F_in = x.shape
    R = len(edge_indices)
    H = params["wl"].shape[-1]
    O = params["wl_f"].shape[-1]

    f_pad = _round_up(F_in, lane)
    h_pad = _round_up(H, lane)
    o_pad = _round_up(O, lane)

    # node-dim padding: multiple of both the row tile tm and the (clamped) K tile tk.
    n_pad0 = _round_up(max(N, tm), tm)
    k_tiles = pl.cdiv(n_pad0, tk)
    tk = _round_up(pl.cdiv(n_pad0, k_tiles), tm)
    n_pad = tk * k_tiles
    m_tiles = n_pad // tm
    inv_r = 1.0 / R

    # ---- glue: pad features, build int8 adjacencies + f32 deg_inv, fold 1/R ---------
    x_p = jnp.zeros((n_pad, f_pad), jnp.bfloat16).at[:N, :F_in].set(
        x.astype(jnp.bfloat16))

    adj = [build_adjacency(e, n_pad) for e in edge_indices]
    a_stack = jnp.stack([a for a, _ in adj])                     # [R, Np, Np] int8
    dinv_stack = jnp.stack([d for _, d in adj])                  # [R, Np, 1]  f32

    wl_p = jnp.zeros((R, f_pad, h_pad), jnp.float32).at[:, :F_in, :H].set(params["wl"])
    wr_p = jnp.zeros((R, f_pad, h_pad), jnp.float32).at[:, :F_in, :H].set(params["wr"])
    w_cat = (jnp.concatenate([wl_p, wr_p], axis=1) * inv_r).astype(jnp.bfloat16)  # [R,2Fp,Hp]
    b1 = jnp.zeros((R, 1, h_pad), jnp.float32).at[:, :, :H].set(params["b"]) * inv_r

    wlf_p = jnp.zeros((h_pad, o_pad), jnp.float32).at[:H, :O].set(params["wl_f"])
    wrf_p = jnp.zeros((h_pad, o_pad), jnp.float32).at[:H, :O].set(params["wr_f"])
    wf_cat = jnp.concatenate([wlf_p, wrf_p], axis=0).astype(jnp.bfloat16)          # [2Hp, Op]
    bf = jnp.zeros((1, o_pad), jnp.float32).at[:, :O].set(params["b_f"])

    vlim = _vmem_limit_bytes()

    # ---- stage 1: per-relation SAGEConv + ReLU, mean over relations -----------------
    hmean = pl.pallas_call(
        partial(_relation_kernel, f_pad=f_pad),
        out_shape=jax.ShapeDtypeStruct((n_pad, h_pad), jnp.bfloat16),
        grid=(m_tiles, R, k_tiles),
        in_specs=[
            pl.BlockSpec((None, tm, tk), lambda i, r, k: (r, i, k)),            # A_r tile (i8)
            pl.BlockSpec((None, tm, 1), lambda i, r, k: (r, i, 0)),             # deg_inv rows
            pl.BlockSpec((tk, f_pad), lambda i, r, k: (k, 0)),                  # X k-slab
            pl.BlockSpec((tm, f_pad), lambda i, r, k: (i, 0)),                  # X row tile
            pl.BlockSpec((None, 2 * f_pad, h_pad), lambda i, r, k: (r, 0, 0)),  # [Wl;Wr]/R
            pl.BlockSpec((None, 1, h_pad), lambda i, r, k: (r, 0, 0)),          # b/R
        ],
        out_specs=pl.BlockSpec((tm, h_pad), lambda i, r, k: (i, 0)),            # resident
        scratch_shapes=[
            pltpu.VMEM((tm, 2 * f_pad), jnp.bfloat16),   # [agg | x] concat buffer
            pltpu.VMEM((tm, f_pad), jnp.float32),        # A@X K-accumulator
            pltpu.VMEM((tm, h_pad), jnp.float32),        # relation-mean accumulator
        ],
        compiler_params=pltpu.CompilerParams(
            dimension_semantics=("parallel", "arbitrary", "arbitrary"),
            vmem_limit_bytes=vlim),
    )(a_stack, dinv_stack, x_p, x_p, w_cat, b1)

    # ---- stage 2: final SAGEConv on edge_indices[0] ----------------------------------
    out_p = pl.pallas_call(
        partial(_final_kernel, h_pad=h_pad),
        out_shape=jax.ShapeDtypeStruct((n_pad, o_pad), jnp.float32),
        grid=(m_tiles, k_tiles),
        in_specs=[
            pl.BlockSpec((tm, tk), lambda i, k: (i, k)),                # A_0 tile (int8)
            pl.BlockSpec((tm, 1), lambda i, k: (i, 0)),                 # deg_inv rows
            pl.BlockSpec((tk, h_pad), lambda i, k: (k, 0)),             # hmean k-slab
            pl.BlockSpec((tm, h_pad), lambda i, k: (i, 0)),             # hmean row tile
            pl.BlockSpec((2 * h_pad, o_pad), lambda i, k: (0, 0)),      # [Wl;Wr] final
            pl.BlockSpec((1, o_pad), lambda i, k: (0, 0)),              # b final
        ],
        out_specs=pl.BlockSpec((tm, o_pad), lambda i, k: (i, 0)),
        scratch_shapes=[
            pltpu.VMEM((tm, 2 * h_pad), jnp.bfloat16),
            pltpu.VMEM((tm, h_pad), jnp.float32),
        ],
        compiler_params=pltpu.CompilerParams(
            dimension_semantics=("parallel", "arbitrary"),
            vmem_limit_bytes=vlim),
    )(a_stack[0], dinv_stack[0], hmean, hmean, wf_cat, bf)

    return out_p[:N, :O]


# ---------------------------------------------------------------------------
# Plain-JAX reference (f32, unpadded) with identical semantics
# ---------------------------------------------------------------------------

def dense_mean_adj(edge_index, size):
    src, dst = edge_index[0], edge_index[1]
    a = jnp.zeros((size, size), jnp.float32).at[dst, src].add(1.0)
    deg = a.sum(axis=1, keepdims=True)
    return a / jnp.where(deg > 0, deg, 1.0)


def mux_gnn_reference(x, edge_indices, params):
    N = x.shape[0]
    R = len(edge_indices)
    xs = []
    for r in range(R):
        a = dense_mean_adj(edge_indices[r], N)
        h = (a @ x) @ params["wl"][r] + x @ params["wr"][r] + params["b"][r]
        xs.append(jnp.maximum(h, 0.0))
    hmean = jnp.stack(xs).mean(axis=0)
    a0 = dense_mean_adj(edge_indices[0], N)
    return (a0 @ hmean) @ params["wl_f"] + hmean @ params["wr_f"] + params["b_f"]


if __name__ == "__main__":
    # Small shapes consistent with MuxGNN(in_channels, hidden, out, num_relations)
    N, F_IN, HID, OUT, R, E = 16, 8, 16, 8, 3, 40

    key = jax.random.PRNGKey(0)
    keys = jax.random.split(key, 8 + 2 * R)

    x = jax.random.normal(keys[0], (N, F_IN), jnp.float32)

    edge_indices = []
    for r in range(R):
        src = jax.random.randint(keys[1 + 2 * r], (E,), 0, N, dtype=jnp.int32)
        dst = jax.random.randint(keys[2 + 2 * r], (E,), 0, N, dtype=jnp.int32)
        edge_indices.append(jnp.stack([src, dst]))

    # Deterministic synthetic parameters (per-relation SAGEConv + final SAGEConv).
    params = {
        "wl": 0.1 * jax.random.normal(keys[1 + 2 * R], (R, F_IN, HID), jnp.float32),
        "wr": 0.1 * jax.random.normal(keys[2 + 2 * R], (R, F_IN, HID), jnp.float32),
        "b": 0.1 * jax.random.normal(keys[3 + 2 * R], (R, 1, HID), jnp.float32),
        "wl_f": 0.1 * jax.random.normal(keys[4 + 2 * R], (HID, OUT), jnp.float32),
        "wr_f": 0.1 * jax.random.normal(keys[5 + 2 * R], (HID, OUT), jnp.float32),
        "b_f": 0.1 * jax.random.normal(keys[6 + 2 * R], (1, OUT), jnp.float32),
    }

    out = mux_gnn_forward(x, edge_indices, params)
    out = jax.block_until_ready(out)

    ref = mux_gnn_reference(x, edge_indices, params)
    assert out.shape == (N, OUT)
    # bf16 features/weights with f32 accumulation (adjacency & 1/deg now exact).
    assert jnp.allclose(out, ref, rtol=3e-2, atol=3e-2), "mismatch vs reference"

    print("KERNEL_OK")
</pallas_src>

<mosaic_0001>
module attributes {stable_mosaic.version = 11 : i64} {
  func.func @_relation_kernel(%arg0: i32, %arg1: i32, %arg2: i32, %arg3: memref<1x256x256xi8, #tpu.memory_space<vmem>>, %arg4: memref<1x256x1xf32, #tpu.memory_space<vmem>>, %arg5: memref<256x128xbf16, #tpu.memory_space<vmem>>, %arg6: memref<256x128xbf16, #tpu.memory_space<vmem>>, %arg7: memref<1x256x128xbf16, #tpu.memory_space<vmem>>, %arg8: memref<1x1x128xf32, #tpu.memory_space<vmem>>, %arg9: memref<256x128xbf16, #tpu.memory_space<vmem>>, %arg10: memref<256x256xbf16, #tpu.memory_space<vmem>>, %arg11: memref<256x128xf32, #tpu.memory_space<vmem>>, %arg12: memref<256x128xf32, #tpu.memory_space<vmem>>) attributes {dimension_semantics = [#tpu.dimension_semantics<parallel>, #tpu.dimension_semantics<arbitrary>, #tpu.dimension_semantics<arbitrary>], iteration_bounds = array<i64: 1, 3, 1>, scalar_prefetch = 0 : i64, scratch_operands = 3 : i64, tpu.core_type = #tpu.core_type<tc>, window_params = [{transform_indices = @transform_0, window_bounds = array<i64: 1, 256, 256>}, {transform_indices = @transform_1, window_bounds = array<i64: 1, 256, 1>}, {transform_indices = @transform_2, window_bounds = array<i64: 256, 128>}, {transform_indices = @transform_3, window_bounds = array<i64: 256, 128>}, {transform_indices = @transform_4, window_bounds = array<i64: 1, 256, 128>}, {transform_indices = @transform_5, window_bounds = array<i64: 1, 1, 128>}, {transform_indices = @transform_6, window_bounds = array<i64: 256, 128>}]} {
    %c0_i32 = arith.constant 0 : i32
    %0 = arith.cmpi eq, %arg1, %c0_i32 : i32
    %c0_i32_0 = arith.constant 0 : i32
    %1 = arith.cmpi eq, %arg2, %c0_i32_0 : i32
    %2 = arith.andi %0, %1 : i1
    %3 = arith.extui %2 : i1 to i32
    %c0_i32_1 = arith.constant 0 : i32
    %4 = arith.cmpi ne, %3, %c0_i32_1 : i32
    scf.if %4 {
      %cst_14 = arith.constant 0.000000e+00 : f32
      %19 = vector.broadcast %cst_14 : f32 to vector<256x128xf32>
      %c0_15 = arith.constant 0 : index
      %c0_16 = arith.constant 0 : index
      %20 = vector.load %arg12[%c0_15, %c0_16] : memref<256x128xf32, #tpu.memory_space<vmem>>, vector<256x128xf32>
      tpu.vector_store %arg12[%c0_15, %c0_16], %19 {strides = array<i32>} : memref<256x128xf32, #tpu.memory_space<vmem>>, vector<256x128xf32>,
      %c0_17 = arith.constant 0 : index
      %c0_18 = arith.constant 0 : index
      %21 = vector.load %arg6[%c0_17, %c0_18] : memref<256x128xbf16, #tpu.memory_space<vmem>>, vector<256x128xbf16>
      %c0_19 = arith.constant 0 : index
      %c128 = arith.constant 128 : index
      %22 = vector.load %arg10[%c0_19, %c128] : memref<256x256xbf16, #tpu.memory_space<vmem>>, vector<256x128xbf16>
      tpu.vector_store %arg10[%c0_19, %c128], %21 {strides = array<i32>} : memref<256x256xbf16, #tpu.memory_space<vmem>>, vector<256x128xbf16>,
    } else {
    }
    %c0_i32_2 = arith.constant 0 : i32
    %5 = arith.cmpi eq, %arg2, %c0_i32_2 : i32
    %6 = arith.extui %5 : i1 to i32
    %c0_i32_3 = arith.constant 0 : i32
    %7 = arith.cmpi ne, %6, %c0_i32_3 : i32
    scf.if %7 {
      %cst_14 = arith.constant 0.000000e+00 : f32
      %19 = vector.broadcast %cst_14 : f32 to vector<256x128xf32>
      %c0_15 = arith.constant 0 : index
      %c0_16 = arith.constant 0 : index
      %20 = vector.load %arg11[%c0_15, %c0_16] : memref<256x128xf32, #tpu.memory_space<vmem>>, vector<256x128xf32>
      tpu.vector_store %arg11[%c0_15, %c0_16], %19 {strides = array<i32>} : memref<256x128xf32, #tpu.memory_space<vmem>>, vector<256x128xf32>,
    } else {
    }
    %c0 = arith.constant 0 : index
    %c0_4 = arith.constant 0 : index
    %8 = vector.load %arg11[%c0, %c0_4] : memref<256x128xf32, #tpu.memory_space<vmem>>, vector<256x128xf32>
    %c0_5 = arith.constant 0 : index
    %c0_6 = arith.constant 0 : index
    %c0_7 = arith.constant 0 : index
    %9 = vector.load %arg3[%c0_5, %c0_6, %c0_7] : memref<1x256x256xi8, #tpu.memory_space<vmem>>, vector<1x256x256xi8>
    %10 = vector.shape_cast %9 : vector<1x256x256xi8> to vector<256x256xi8>
    %11 = arith.sitofp %10 : vector<256x256xi8> to vector<256x256xbf16>
    %c0_8 = arith.constant 0 : index
    %c0_9 = arith.constant 0 : index
    %12 = vector.load %arg5[%c0_8, %c0_9] : memref<256x128xbf16, #tpu.memory_space<vmem>>, vector<256x128xbf16>
    %cst = arith.constant dense<0.000000e+00> : vector<256x128xf32>
    %13 = tpu.matmul %11, %12, %cst {dimension_numbers = #tpu.dot_dimension_numbers<[1], [0], [0], [1], [0, 0, 1, 1], [], []>} : vector<256x256xbf16>, vector<256x128xbf16>, vector<256x128xf32> -> vector<256x128xf32>
    %14 = arith.addf %8, %13 : vector<256x128xf32>
    %c0_10 = arith.constant 0 : index
    %c0_11 = arith.constant 0 : index
    %15 = vector.load %arg11[%c0_10, %c0_11] : memref<256x128xf32, #tpu.memory_space<vmem>>, vector<256x128xf32>
    tpu.vector_store %arg11[%c0_10, %c0_11], %14 {strides = array<i32>} : memref<256x128xf32, #tpu.memory_space<vmem>>, vector<256x128xf32>,
    %c0_i32_12 = arith.constant 0 : i32
    %16 = arith.cmpi eq, %arg2, %c0_i32_12 : i32
    %17 = arith.extui %16 : i1 to i32
    %c0_i32_13 = arith.constant 0 : i32
    %18 = arith.cmpi ne, %17, %c0_i32_13 : i32
    scf.if %18 {
      %c0_14 = arith.constant 0 : index
      %c0_15 = arith.constant 0 : index
      %19 = vector.load %arg11[%c0_14, %c0_15] : memref<256x128xf32, #tpu.memory_space<vmem>>, vector<256x128xf32>
      %c0_16 = arith.constant 0 : index
      %c0_17 = arith.constant 0 : index
      %c0_18 = arith.constant 0 : index
      %20 = vector.load %arg4[%c0_16, %c0_17, %c0_18] : memref<1x256x1xf32, #tpu.memory_space<vmem>>, vector<1x256x1xf32>
      %21 = vector.shape_cast %20 : vector<1x256x1xf32> to vector<256x1xf32>
      %22 = vector.broadcast %21 : vector<256x1xf32> to vector<256x128xf32>
      %23 = arith.mulf %19, %22 : vector<256x128xf32>
      %24 = arith.truncf %23 : vector<256x128xf32> to vector<256x128xbf16>
      %c0_19 = arith.constant 0 : index
      %c0_20 = arith.constant 0 : index
      %25 = vector.load %arg10[%c0_19, %c0_20] : memref<256x256xbf16, #tpu.memory_space<vmem>>, vector<256x128xbf16>
      tpu.vector_store %arg10[%c0_19, %c0_20], %24 {strides = array<i32>} : memref<256x256xbf16, #tpu.memory_space<vmem>>, vector<256x128xbf16>,
      %c0_21 = arith.constant 0 : index
      %c0_22 = arith.constant 0 : index
      %26 = vector.load %arg10[%c0_21, %c0_22] : memref<256x256xbf16, #tpu.memory_space<vmem>>, vector<256x256xbf16>
      %c0_23 = arith.constant 0 : index
      %c0_24 = arith.constant 0 : index
      %c0_25 = arith.constant 0 : index
      %27 = vector.load %arg7[%c0_23, %c0_24, %c0_25] : memref<1x256x128xbf16, #tpu.memory_space<vmem>>, vector<1x256x128xbf16>
      %28 = vector.shape_cast %27 : vector<1x256x128xbf16> to vector<256x128xbf16>
      %cst_26 = arith.constant dense<0.000000e+00> : vector<256x128xf32>
      %29 = tpu.matmul %26, %28, %cst_26 {dimension_numbers = #tpu.dot_dimension_numbers<[1], [0], [0], [1], [0, 0, 1, 1], [], []>} : vector<256x256xbf16>, vector<256x128xbf16>, vector<256x128xf32> -> vector<256x128xf32>
      %c0_27 = arith.constant 0 : index
      %c0_28 = arith.constant 0 : index
      %c0_29 = arith.constant 0 : index
      %30 = vector.load %arg8[%c0_27, %c0_28, %c0_29] : memref<1x1x128xf32, #tpu.memory_space<vmem>>, vector<1x1x128xf32>
      %31 = vector.shape_cast %30 : vector<1x1x128xf32> to vector<1x128xf32>
      %32 = vector.broadcast %31 : vector<1x128xf32> to vector<256x128xf32>
      %33 = arith.addf %29, %32 : vector<256x128xf32>
      %c0_30 = arith.constant 0 : index
      %c0_31 = arith.constant 0 : index
      %34 = vector.load %arg12[%c0_30, %c0_31] : memref<256x128xf32, #tpu.memory_space<vmem>>, vector<256x128xf32>
      %cst_32 = arith.constant 0.000000e+00 : f32
      %35 = vector.broadcast %cst_32 : f32 to vector<256x128xf32>
      %36 = arith.maximumf %33, %35 : vector<256x128xf32>
      %37 = arith.addf %34, %36 : vector<256x128xf32>
      %c0_33 = arith.constant 0 : index
      %c0_34 = arith.constant 0 : index
      %38 = vector.load %arg12[%c0_33, %c0_34] : memref<256x128xf32, #tpu.memory_space<vmem>>, vector<256x128xf32>
      tpu.vector_store %arg12[%c0_33, %c0_34], %37 {strides = array<i32>} : memref<256x128xf32, #tpu.memory_space<vmem>>, vector<256x128xf32>,
      %c2_i32 = arith.constant 2 : i32
      %39 = arith.cmpi eq, %arg1, %c2_i32 : i32
      %40 = arith.extui %39 : i1 to i32
      %c0_i32_35 = arith.constant 0 : i32
      %41 = arith.cmpi ne, %40, %c0_i32_35 : i32
      scf.if %41 {
        %c0_36 = arith.constant 0 : index
        %c0_37 = arith.constant 0 : index
        %42 = vector.load %arg12[%c0_36, %c0_37] : memref<256x128xf32, #tpu.memory_space<vmem>>, vector<256x128xf32>
        %43 = arith.truncf %42 : vector<256x128xf32> to vector<256x128xbf16>
        %c0_38 = arith.constant 0 : index
        %c0_39 = arith.constant 0 : index
        %44 = vector.load %arg9[%c0_38, %c0_39] : memref<256x128xbf16, #tpu.memory_space<vmem>>, vector<256x128xbf16>
        tpu.vector_store %arg9[%c0_38, %c0_39], %43 {strides = array<i32>} : memref<256x128xbf16, #tpu.memory_space<vmem>>, vector<256x128xbf16>,
      } else {
      }
    } else {
    }
    return
  }
  func.func @transform_0(%arg0: i32, %arg1: i32, %arg2: i32) -> (i32, i32, i32) {
    %c0_i32 = arith.constant 0 : i32
    return %arg1, %arg0, %arg2 : i32, i32, i32
  }
  func.func @transform_1(%arg0: i32, %arg1: i32, %arg2: i32) -> (i32, i32, i32) {
    %c0_i32 = arith.constant 0 : i32
    %c0_i32_0 = arith.constant 0 : i32
    return %arg1, %arg0, %c0_i32 : i32, i32, i32
  }
  func.func @transform_2(%arg0: i32, %arg1: i32, %arg2: i32) -> (i32, i32) {
    %c0_i32 = arith.constant 0 : i32
    %c0_i32_0 = arith.constant 0 : i32
    return %arg2, %c0_i32 : i32, i32
  }
  func.func @transform_3(%arg0: i32, %arg1: i32, %arg2: i32) -> (i32, i32) {
    %c0_i32 = arith.constant 0 : i32
    %c0_i32_0 = arith.constant 0 : i32
    return %arg0, %c0_i32 : i32, i32
  }
  func.func @transform_4(%arg0: i32, %arg1: i32, %arg2: i32) -> (i32, i32, i32) {
    %c0_i32 = arith.constant 0 : i32
    %c0_i32_0 = arith.constant 0 : i32
    %c0_i32_1 = arith.constant 0 : i32
    return %arg1, %c0_i32, %c0_i32_0 : i32, i32, i32
  }
  func.func @transform_5(%arg0: i32, %arg1: i32, %arg2: i32) -> (i32, i32, i32) {
    %c0_i32 = arith.constant 0 : i32
    %c0_i32_0 = arith.constant 0 : i32
    %c0_i32_1 = arith.constant 0 : i32
    return %arg1, %c0_i32, %c0_i32_0 : i32, i32, i32
  }
  func.func @transform_6(%arg0: i32, %arg1: i32, %arg2: i32) -> (i32, i32) {
    %c0_i32 = arith.constant 0 : i32
    %c0_i32_0 = arith.constant 0 : i32
    return %arg0, %c0_i32 : i32, i32
  }
}

</mosaic_0001>

<bundles_post_ra>
// kernel: tpu_custom_call.1
= control target key start
LH: loop header
LB: loop body
LE: loop exit
PB: predicated region body
PF: predicated region fallthrough
CT: control target
= control target key end

     0   :  { %11 = vsyncpa [#allocation6], 0  ;;  %s3415_s0 = inlined_call_operand.vmem [shape: s8[3,256,256], index: 0, kind: input, shape index: {}]   ;;  %s3416_s1 = inlined_call_operand.vmem [shape: f32[3,256,1], index: 1, kind: input, shape index: {}]   ;;  %s3417_s2 = inlined_call_operand.hbm [shape: bf16[256,128], index: 2, kind: input, shape index: {}]   ;;  %s3418_s3 = inlined_call_operand.hbm [shape: bf16[256,128], index: 3, kind: input, shape index: {}]   ;;  %s3419_s4 = inlined_call_operand.vmem [shape: bf16[3,256,128], index: 4, kind: input, shape index: {}]   ;;  %s3420_s5 = inlined_call_operand.vmem [shape: f32[3,1,128], index: 5, kind: input, shape index: {}]   ;;  %s3421_s6 = inlined_call_operand.hbm [shape: bf16[256,128], index: 6, kind: output, shape index: {}]  }
   0x1   :  { %12 = vsyncpa [#allocation9], 0 }
   0x2   :  { %13 = vsyncpa [#allocation7], 0  ;;  %s3192_s21 = smov 0   ;;  %s3194_s22 = smov 0  }
   0x3   :  { %s3196_s23 = smov 0  }
   0x4 LB: > { %s2360_s24 = sadd.s32 4294967295, %s3146_s23   ;;  %s34_s25 = sadd.s32 1, %s3142_s22  ;;  %s3146_s23 = sphi %s3196_s23, %s19_s23   ;;  %s3142_s22 = sphi %s3194_s22, %s3427_s22   ;;  %s3138_s21 = sphi %s3192_s21, %s3426_s21  }
   0x5   : > { %p36_p0 = scmp.ge.s32.totalorder %s34_s25, 3  ;;  %p2361_p1 = scmp.ge.s32.totalorder %s3146_s23, 1 }
   0x6   : > { %p231_p2 = scmp.lt.s32.totalorder %s3146_s23, 4  ;;  %p3219_p4 = scmp.eq.s32.totalorder %s2360_s24, 0 }
   0x7   : > { %s3429_s25 = smov (%p36_p0, %s34_s25), 0  ;;  %s3148_s28 = smov [#allocation5]  }
   0x8   : > { %p3213_p3 = pnand %p2361_p1, %p231_p2  ;;  %s246_s29 = sshll.u32 %s3148_s28, 4  ;;  %s247_s29 = int_to_ptr.vmem [resolvable:$true] %s246_s29 }
   0x9   : > { %s3149_s7 = smov [#allocation8]   ;;  %s3047_s9 = scalar_lea.vmem %s247_s29, 2048 }
   0xa   : > { %p2908_p5 = pneg %p3213_p3  ;;  %s262_s8 = sshll.u32 %s3149_s7, 4  ;;  %s263_s8 = int_to_ptr.vmem [resolvable:$true] %s262_s8 }
   0xb   : > { %p3048_p8 = scmp.ne.s32.totalorder %s247_s29, %s3047_s9  ;;  %p3055_p11 = scmp.lt.s32.totalorder %s247_s29, %s247_s29 }
   0xc   : > { %p3227_p6 = pnand %p3219_p4, %p2908_p5  ;;  %p3056_p12 = scmp.lt.s32.totalorder %s3047_s9, %s3047_s9 }
   0xe   : > { %p3038_p7 = pneg %p3227_p6  ;;  %p3057_p13 = por %p3056_p12, %p3055_p11 }
  0x10   : > { %p3050_p9 = pnand %p3048_p8, %p3038_p7 }
  0x12   : > { %p3051_p10 = pneg %p3050_p9 }
  0x14   : > { %p3058_p0 = pnand %p3057_p13, %p3051_p10 }
  0x16   : > { %3061 = shalt.err (!%p3058_p0)
}
  0x17   : > { %s3150_s10 = smov 64   ;;  %s3151_s11 = smov 4  }
  0x18   : > { %2911 = dma.hbm_to_vmem [thread:$0]  (!%p3227_p6), %s3417_s2, 2048, %s247_s29, [#allocation6], %s3150_s10, %s3150_s10, %s3151_s11  }
  0x19   : > { %s3073_s14 = scalar_lea.vmem %s263_s8, 2048  ;;  %p3081_p8 = scmp.lt.s32.totalorder %s263_s8, %s263_s8 }
  0x1a   : > { %p3074_p1 = scmp.ne.s32.totalorder %s263_s8, %s3073_s14  ;;  %p3082_p9 = scmp.lt.s32.totalorder %s3073_s14, %s3073_s14 }
  0x1c   : > { %p3076_p2 = pnand %p3074_p1, %p3038_p7  ;;  %p3083_p11 = por %p3082_p9, %p3081_p8 }
  0x1e   : > { %p3077_p5 = pneg %p3076_p2 }
  0x20   : > { %p3084_p10 = pnand %p3083_p11, %p3077_p5 }
  0x22   : > { %3087 = shalt.err (!%p3084_p10)
}
  0x23   : > { %2914 = dma.hbm_to_vmem [thread:$0]  (!%p3227_p6), %s3418_s3, 2048, %s263_s8, [#allocation9], %s3150_s10, %s3150_s10, %s3151_s11  }
  0x24   : > { %324 = sbr.rel (%p3213_p3) target bundleno = 684 (0x2ac), region = 44 }
  0x29   : > { %3125 = dma.done.wait (%p3219_p4), [#allocation6], 2048  }
  0x2a   : > { %3127 = vsyncadd (%p3219_p4), [#allocation6], 4294965248 }
  0x2b   : > { %3129 = dma.done.wait (%p3219_p4), [#allocation9], 2048  }
  0x2c   : > { %3131 = vsyncadd (%p3219_p4), [#allocation9], 4294965248  ;;  %p381_p7 = scmp.lt.s32.totalorder %s3138_s21, 2  ;;  %p417_p6 = scmp.eq.s32.totalorder %s3138_s21, 0 }
  0x2d   : > { %v455_v0 = vld [vmem:[#allocation8] sm:$0xf] (%p417_p6)  ;;  %v456_v1 = vld [vmem:[#allocation8 + $0x4] sm:$0xf] (%p417_p6)  ;;  %v3152_v2 = vmov (%p417_p6), 0.0  }
  0x2e   : > { %s3262_s17 = scalar_select %p381_p7, %s3138_s21, 2  ;;  %423 = vst [vmem:[#allocation4 + $0xb0] sm:$0xff] (%p417_p6), %v3152_v2  ;;  %424 = vst [vmem:[#allocation4] sm:$0xff] (%p417_p6), %v3152_v2  ;;  %v457_v3 = vld [vmem:[#allocation8 + $0x8] sm:$0xf] (%p417_p6) }
  0x2f   : > { %422 = sbr.rel (!%p417_p6) target bundleno = 78 (0x4e), region = 56  ;;  %425 = vst [vmem:[#allocation4 + $0xd8] sm:$0xff] (%p417_p6), %v3152_v2  ;;  %426 = vst [vmem:[#allocation4 + $0x18] sm:$0xff] (%p417_p6), %v3152_v2  ;;  %v458_v4 = vld [vmem:[#allocation8 + $0xc] sm:$0xf] (%p417_p6) }
  0x30   : > { %s2509_s18 = sshll.u32 %s3262_s17, 7  ;;  %s2510_s19 = sshll.u32 %s3262_s17, 8  ;;  %427 = vst [vmem:[#allocation4 + $0x50] sm:$0xff] (%p417_p6), %v3152_v2  ;;  %428 = vst [vmem:[#allocation4 + $0x68] sm:$0xff] (%p417_p6), %v3152_v2  ;;  %v459_v5 = vld [vmem:[#allocation8 + $0x10] sm:$0xf] (%p417_p6) }
  0x31   : > { %s3269_s28 = scalar_lea.vmem %s3415_s0, %s2509_s18  ;;  %s3274_s30 = scalar_lea.vmem %s3416_s1, %s2510_s19  ;;  %429 = vst [vmem:[#allocation4 + $0x30] sm:$0xff] (%p417_p6), %v3152_v2  ;;  %430 = vst [vmem:[#allocation4 + $0x48] sm:$0xff] (%p417_p6), %v3152_v2  ;;  %v460_v6 = vld [vmem:[#allocation8 + $0x14] sm:$0xf] (%p417_p6)  ;;  %v461_v7 = vld [vmem:[#allocation8 + $0x18] sm:$0xf] (%p417_p6) }
  0x32   : > { %s3279_s9 = scalar_lea.vmem %s3419_s4, %s2509_s18  ;;  %s414_s12 = scalar_lea.vmem %s3420_s5, %s3262_s17  ;;  %431 = vst [vmem:[#allocation4 + $0x80] sm:$0xff] (%p417_p6), %v3152_v2  ;;  %432 = vst [vmem:[#allocation4 + $0x88] sm:$0xff] (%p417_p6), %v3152_v2  ;;  %v462_v8 = vld [vmem:[#allocation8 + $0x1c] sm:$0xf] (%p417_p6)  ;;  %v463_v9 = vld [vmem:[#allocation8 + $0x20] sm:$0xf] (%p417_p6) }
  0x33   : > { %433 = vst [vmem:[#allocation4 + $0xe8] sm:$0xff] (%p417_p6), %v3152_v2  ;;  %434 = vst [vmem:[#allocation4 + $0xb8] sm:$0xff] (%p417_p6), %v3152_v2  ;;  %v464_v10 = vld [vmem:[#allocation8 + $0x24] sm:$0xf] (%p417_p6)  ;;  %v465_v11 = vld [vmem:[#allocation8 + $0x28] sm:$0xf] (%p417_p6) }
  0x34   : > { %435 = vst [vmem:[#allocation4 + $0x60] sm:$0xff] %v3152_v2  ;;  %436 = vst [vmem:[#allocation4 + $0xf0] sm:$0xff] %v3152_v2  ;;  %v466_v12 = vld [vmem:[#allocation8 + $0x2c] sm:$0xf]  ;;  %v467_v13 = vld [vmem:[#allocation8 + $0x30] sm:$0xf] }
  0x35   : > { %437 = vst [vmem:[#allocation4 + $0x8] sm:$0xff] %v3152_v2  ;;  %438 = vst [vmem:[#allocation4 + $0x78] sm:$0xff] %v3152_v2  ;;  %v468_v14 = vld [vmem:[#allocation8 + $0x34] sm:$0xf]  ;;  %v469_v15 = vld [vmem:[#allocation8 + $0x38] sm:$0xf] }
  0x36   : > { %439 = vst [vmem:[#allocation4 + $0x38] sm:$0xff] %v3152_v2  ;;  %440 = vst [vmem:[#allocation4 + $0x58] sm:$0xff] %v3152_v2  ;;  %v470_v16 = vld [vmem:[#allocation8 + $0x3c] sm:$0xf]  ;;  %v471_v17 = vld [vmem:[#allocation8 + $0x40] sm:$0xf] }
  0x37   : > { %441 = vst [vmem:[#allocation4 + $0x40] sm:$0xff] %v3152_v2  ;;  %442 = vst [vmem:[#allocation4 + $0xc8] sm:$0xff] %v3152_v2  ;;  %v472_v18 = vld [vmem:[#allocation8 + $0x44] sm:$0xf]  ;;  %v473_v19 = vld [vmem:[#allocation8 + $0x48] sm:$0xf] }
  0x38   : > { %443 = vst [vmem:[#allocation4 + $0xe0] sm:$0xff] %v3152_v2  ;;  %444 = vst [vmem:[#allocation4 + $0x90] sm:$0xff] %v3152_v2  ;;  %v474_v20 = vld [vmem:[#allocation8 + $0x4c] sm:$0xf]  ;;  %v475_v21 = vld [vmem:[#allocation8 + $0x50] sm:$0xf] }
  0x39   : > { %445 = vst [vmem:[#allocation4 + $0x70] sm:$0xff] %v3152_v2  ;;  %446 = vst [vmem:[#allocation4 + $0xc0] sm:$0xff] %v3152_v2  ;;  %v476_v22 = vld [vmem:[#allocation8 + $0x54] sm:$0xf]  ;;  %v477_v23 = vld [vmem:[#allocation8 + $0x58] sm:$0xf] }
  0x3a   : > { %447 = vst [vmem:[#allocation4 + $0xa8] sm:$0xff] %v3152_v2  ;;  %448 = vst [vmem:[#allocation4 + $0xd0] sm:$0xff] %v3152_v2  ;;  %v478_v24 = vld [vmem:[#allocation8 + $0x5c] sm:$0xf]  ;;  %v479_v25 = vld [vmem:[#allocation8 + $0x60] sm:$0xf] }
  0x3b   : > { %449 = vst [vmem:[#allocation4 + $0x10] sm:$0xff] %v3152_v2  ;;  %450 = vst [vmem:[#allocation4 + $0x28] sm:$0xff] %v3152_v2  ;;  %v480_v26 = vld [vmem:[#allocation8 + $0x64] sm:$0xf]  ;;  %v481_v27 = vld [vmem:[#allocation8 + $0x68] sm:$0xf] }
  0x3c   : > { %451 = vst [vmem:[#allocation4 + $0xa0] sm:$0xff] %v3152_v2  ;;  %452 = vst [vmem:[#allocation4 + $0xf8] sm:$0xff] %v3152_v2  ;;  %v482_v28 = vld [vmem:[#allocation8 + $0x6c] sm:$0xf]  ;;  %v483_v29 = vld [vmem:[#allocation8 + $0x70] sm:$0xf] }
  0x3d   : > { %453 = vst [vmem:[#allocation4 + $0x20] sm:$0xff] %v3152_v2  ;;  %454 = vst [vmem:[#allocation4 + $0x98] sm:$0xff] %v3152_v2  ;;  %v484_v30 = vld [vmem:[#allocation8 + $0x74] sm:$0xf]  ;;  %v485_v31 = vld [vmem:[#allocation8 + $0x78] sm:$0xf] }
  0x3e   : > { %487 = vst [vmem:[#allocation2 + $0x4] sm:$0xf] %v455_v0  ;;  %488 = vst [vmem:[#allocation2 + $0xc] sm:$0xf] %v456_v1  ;;  %v486_v32 = vld [vmem:[#allocation8 + $0x7c] sm:$0xf] }
  0x3f   : > { %489 = vst [vmem:[#allocation2 + $0x14] sm:$0xf] %v457_v3  ;;  %490 = vst [vmem:[#allocation2 + $0x1c] sm:$0xf] %v458_v4 }
  0x40   : > { %491 = vst [vmem:[#allocation2 + $0x24] sm:$0xf] %v459_v5  ;;  %492 = vst [vmem:[#allocation2 + $0x2c] sm:$0xf] %v460_v6 }
  0x41   : > { %493 = vst [vmem:[#allocation2 + $0x34] sm:$0xf] %v461_v7  ;;  %494 = vst [vmem:[#allocation2 + $0x3c] sm:$0xf] %v462_v8 }
  0x42   : > { %495 = vst [vmem:[#allocation2 + $0x44] sm:$0xf] %v463_v9  ;;  %496 = vst [vmem:[#allocation2 + $0x4c] sm:$0xf] %v464_v10 }
  0x43   : > { %497 = vst [vmem:[#allocation2 + $0x54] sm:$0xf] %v465_v11  ;;  %498 = vst [vmem:[#allocation2 + $0x5c] sm:$0xf] %v466_v12 }
  0x44   : > { %499 = vst [vmem:[#allocation2 + $0x64] sm:$0xf] %v467_v13  ;;  %500 = vst [vmem:[#allocation2 + $0x6c] sm:$0xf] %v468_v14 }
  0x45   : > { %501 = vst [vmem:[#allocation2 + $0x74] sm:$0xf] %v469_v15  ;;  %502 = vst [vmem:[#allocation2 + $0x7c] sm:$0xf] %v470_v16 }
  0x46   : > { %503 = vst [vmem:[#allocation2 + $0x84] sm:$0xf] %v471_v17  ;;  %504 = vst [vmem:[#allocation2 + $0x8c] sm:$0xf] %v472_v18 }
  0x47   : > { %505 = vst [vmem:[#allocation2 + $0x94] sm:$0xf] %v473_v19  ;;  %506 = vst [vmem:[#allocation2 + $0x9c] sm:$0xf] %v474_v20 }
  0x48   : > { %507 = vst [vmem:[#allocation2 + $0xa4] sm:$0xf] %v475_v21  ;;  %508 = vst [vmem:[#allocation2 + $0xac] sm:$0xf] %v476_v22 }
  0x49   : > { %509 = vst [vmem:[#allocation2 + $0xb4] sm:$0xf] %v477_v23  ;;  %510 = vst [vmem:[#allocation2 + $0xbc] sm:$0xf] %v478_v24 }
  0x4a   : > { %511 = vst [vmem:[#allocation2 + $0xc4] sm:$0xf] %v479_v25  ;;  %512 = vst [vmem:[#allocation2 + $0xcc] sm:$0xf] %v480_v26 }
  0x4b   : > { %513 = vst [vmem:[#allocation2 + $0xd4] sm:$0xf] %v481_v27  ;;  %514 = vst [vmem:[#allocation2 + $0xdc] sm:$0xf] %v482_v28 }
  0x4c   : > { %515 = vst [vmem:[#allocation2 + $0xe4] sm:$0xf] %v483_v29  ;;  %516 = vst [vmem:[#allocation2 + $0xec] sm:$0xf] %v484_v30 }
  0x4d   : > { %517 = vst [vmem:[#allocation2 + $0xf4] sm:$0xf] %v485_v31  ;;  %518 = vst [vmem:[#allocation2 + $0xfc] sm:$0xf] %v486_v32 }
  0x4e PF: > { %v2956_v33 = vld [vmem:[#allocation5 + $0x78] sm:$0xff]   ;;  %v3153_v35 = vmov 0   ;;  %v2958_v36 = vld [vmem:[#allocation5 + $0x70] sm:$0xff]   ;;  %v2960_v38 = vld [vmem:[#allocation5 + $0x68] sm:$0xff]   ;;  %p2472_p3 = scmp.ne.s32.totalorder %s3138_s21, 2 }
  0x4f   : > { %v2957_v34 = vld [vmem:[#allocation5 + $0x38] sm:$0xff]   ;;  %2954 = vset.pattern.permute.xlu0 %v3153_v35  ;;  %2955 = vset.pattern.permute.xlu1 %v3153_v35  ;;  %v2959_v37 = vld [vmem:[#allocation5 + $0x30] sm:$0xff]   ;;  %v2961_v39 = vld [vmem:[#allocation5 + $0x28] sm:$0xff]  }
  0x50   : > { %2672 = vmatprep.subr.bf16.mxu0 %v2956_v33  ;;  %v2962_v40 = vld [vmem:[#allocation5 + $0x60] sm:$0xff]   ;;  %v2964_v42 = vld [vmem:[#allocation5 + $0x58] sm:$0xff]   ;;  %v2966_v44 = vld [vmem:[#allocation5 + $0x50] sm:$0xff]  }
  0x51   : > { %2673 = vmatpush3.bf16.msra.mxu0 %v2957_v34  ;;  %v2963_v41 = vld [vmem:[#allocation5 + $0x20] sm:$0xff]   ;;  %v2965_v43 = vld [vmem:[#allocation5 + $0x18] sm:$0xff]   ;;  %v587_v45 = vld [vmem:[%s3269_s28 + $0x8] sm:$0xff] }
  0x52   : > { %2674 = vmatprep.subr.bf16.mxu0 %v2958_v36  ;;  %v1022_v46 = vld [vmem:[%s3274_s30] sm:$0xff]  ;;  %v603_v47 = vunpack.c.l.s8.bf16 %v587_v45  ;;  %v1023_v48 = vld [vmem:[%s3274_s30 + $0x8] sm:$0xff]  ;;  %v1024_v49 = vld [vmem:[%s3274_s30 + $0x10] sm:$0xff]  ;;  %v605_v63 = vunpack.c.h.s8.bf16 %v587_v45 }
  0x53   : > { %1056 = vperm.xlu0 %2954, %v1022_v46   ;;  %v2967_v50 = vld [vmem:[#allocation5 + $0x10] sm:$0xff]   ;;  %v2968_v51 = vld [vmem:[#allocation5 + $0x48] sm:$0xff]   ;;  %1066 = vperm.xlu1 %2955, %v1024_v49   ;;  %v1025_v52 = vld [vmem:[%s3274_s30 + $0x18] sm:$0xff] }
  0x54   : > { %794 = vmatprep.mubr.bf16.mxu0 %v603_v47  ;;  %v1026_v53 = vld [vmem:[%s3274_s30 + $0x20] sm:$0xff]  ;;  %v2969_v54 = vld [vmem:[#allocation5 + $0x8] sm:$0xff]   ;;  %v1028_v57 = vld [vmem:[%s3274_s30 + $0x30] sm:$0xff] }
  0x55   : > { %2675 = vmatpush3.bf16.msra.mxu0 %v2959_v37  ;;  %v2970_v55 = vld [vmem:[#allocation5 + $0x40] sm:$0xff]   ;;  %v1027_v56 = vld [vmem:[%s3274_s30 + $0x28] sm:$0xff]  ;;  %v1029_v60 = vld [vmem:[%s3274_s30 + $0x38] sm:$0xff] }
  0x56   : > { %2676 = vmatprep.subr.bf16.mxu0 %v2960_v38  ;;  %v2971_v58 = vld [vmem:[#allocation5] sm:$0xff]   ;;  %v1031_v0 = vld [vmem:[%s3274_s30 + $0x48] sm:$0xff]  ;;  %v1032_v1 = vld [vmem:[%s3274_s30 + $0x50] sm:$0xff] }
  0x57   : > { %1061 = vperm.xlu0 %2954, %v1023_v48   ;;  %1071 = vperm.xlu1 %2955, %v1025_v52   ;;  %v586_v59 = vld [vmem:[%s3269_s28] sm:$0xff]  ;;  %v589_v2 = vld [vmem:[%s3269_s28 + $0x18] sm:$0xff]  ;;  %v1035_v7 = vld [vmem:[%s3274_s30 + $0x68] sm:$0xff] }
  0x58   : > { %v602_v61 = vunpack.c.l.s8.bf16 %v586_v59  ;;  %v1030_v62 = vld [vmem:[%s3274_s30 + $0x40] sm:$0xff]  ;;  %v1033_v3 = vld [vmem:[%s3274_s30 + $0x58] sm:$0xff]  ;;  %v604_v5 = vunpack.c.h.s8.bf16 %v586_v59  ;;  %v607_v6 = vunpack.c.l.s8.bf16 %v589_v2  ;;  %v1036_v8 = vld [vmem:[%s3274_s30 + $0x70] sm:$0xff]  ;;  %v609_v13 = vunpack.c.h.s8.bf16 %v589_v2 }
  0x59   : > { %2677 = vmatpush3.bf16.msra.mxu0 %v2961_v39  ;;  %v1034_v4 = vld [vmem:[%s3274_s30 + $0x60] sm:$0xff]  ;;  %v588_v9 = vld [vmem:[%s3269_s28 + $0x10] sm:$0xff]  ;;  %v1037_v10 = vld [vmem:[%s3274_s30 + $0x78] sm:$0xff] }
  0x5a   : > { %2678 = vmatprep.subr.bf16.mxu0 %v2962_v40  ;;  %v606_v11 = vunpack.c.l.s8.bf16 %v588_v9  ;;  %v1038_v12 = vld [vmem:[%s3274_s30 + $0x80] sm:$0xff]  ;;  %v1039_v14 = vld [vmem:[%s3274_s30 + $0x88] sm:$0xff]  ;;  %v1040_v15 = vld [vmem:[%s3274_s30 + $0x90] sm:$0xff]  ;;  %v608_v18 = vunpack.c.h.s8.bf16 %v588_v9 }
  0x5b   : > { %1076 = vperm.xlu0 %2954, %v1026_v53   ;;  %1081 = vperm.xlu1 %2955, %v1027_v56   ;;  %v591_v16 = vld [vmem:[%s3269_s28 + $0x28] sm:$0xff]  ;;  %v1041_v17 = vld [vmem:[%s3274_s30 + $0x98] sm:$0xff]  ;;  %v1042_v19 = vld [vmem:[%s3274_s30 + $0xa0] sm:$0xff] }
  0x5c   : > { %v611_v20 = vunpack.c.l.s8.bf16 %v591_v16  ;;  %v2972_v21 = vld [vmem:[%s3279_s9 + $0x78] sm:$0xff]   ;;  %v1043_v22 = vld [vmem:[%s3274_s30 + $0xa8] sm:$0xff]  ;;  %v1044_v23 = vld [vmem:[%s3274_s30 + $0xb0] sm:$0xff]  ;;  %v613_v30 = vunpack.c.h.s8.bf16 %v591_v16 }
  0x5d   : > { %2679 = vmatpush3.bf16.msra.mxu0 %v2963_v41  ;;  %2784 = vmatprep.subr.bf16.mxu1 %v2972_v21  ;;  %v590_v24 = vld [vmem:[%s3269_s28 + $0x20] sm:$0xff]  ;;  %v2973_v25 = vld [vmem:[%s3279_s9 + $0x38] sm:$0xff]   ;;  %v2974_v26 = vld [vmem:[%s3279_s9 + $0x70] sm:$0xff]  }
  0x5e   : > { %2680 = vmatprep.subr.bf16.mxu0 %v2964_v42  ;;  %v1045_v27 = vld [vmem:[%s3274_s30 + $0xb8] sm:$0xff]  ;;  %v610_v28 = vunpack.c.l.s8.bf16 %v590_v24  ;;  %v1046_v29 = vld [vmem:[%s3274_s30 + $0xc0] sm:$0xff]  ;;  %2785 = vmatpush3.bf16.msra.mxu1 %v2973_v25  ;;  %v2975_v31 = vld [vmem:[%s3279_s9 + $0x30] sm:$0xff]   ;;  %v612_v37 = vunpack.c.h.s8.bf16 %v590_v24 }
  0x5f   : > { %1086 = vperm.xlu0 %2954, %v1028_v57   ;;  %1091 = vperm.xlu1 %2955, %v1029_v60   ;;  %v2976_v32 = vld [vmem:[%s3279_s9 + $0x68] sm:$0xff]   ;;  %v1048_v34 = vld [vmem:[%s3274_s30 + $0xd0] sm:$0xff]  ;;  %v593_v35 = vld [vmem:[%s3269_s28 + $0x38] sm:$0xff] }
  0x60   : > { %2786 = vmatprep.subr.bf16.mxu1 %v2974_v26  ;;  %v1047_v33 = vld [vmem:[%s3274_s30 + $0xc8] sm:$0xff]  ;;  %v1049_v36 = vld [vmem:[%s3274_s30 + $0xd8] sm:$0xff]  ;;  %v1050_v38 = vld [vmem:[%s3274_s30 + $0xe0] sm:$0xff]  ;;  %v615_v39 = vunpack.c.l.s8.bf16 %v593_v35  ;;  %v617_v45 = vunpack.c.h.s8.bf16 %v593_v35 }
  0x61   : > { %2681 = vmatpush3.bf16.msra.mxu0 %v2965_v43  ;;  %v1051_v40 = vld [vmem:[%s3274_s30 + $0xe8] sm:$0xff]  ;;  %v1052_v41 = vld [vmem:[%s3274_s30 + $0xf0] sm:$0xff]  ;;  %v1053_v43 = vld [vmem:[%s3274_s30 + $0xf8] sm:$0xff] }
  0x62   : > { %2682 = vmatprep.subr.bf16.mxu0 %v2966_v44  ;;  %2787 = vmatpush3.bf16.msra.mxu1 %v2975_v31  ;;  %v592_v42 = vld [vmem:[%s3269_s28 + $0x30] sm:$0xff]  ;;  %v595_v46 = vld [vmem:[%s3269_s28 + $0x48] sm:$0xff]  ;;  %v594_v49 = vld [vmem:[%s3269_s28 + $0x40] sm:$0xff] }
  0x63   : > { %1096 = vperm.xlu0 %2954, %v1030_v62   ;;  %1101 = vperm.xlu1 %2955, %v1031_v0   ;;  %v614_v44 = vunpack.c.l.s8.bf16 %v592_v42  ;;  %v616_v47 = vunpack.c.h.s8.bf16 %v592_v42  ;;  %v619_v48 = vunpack.c.l.s8.bf16 %v595_v46  ;;  %v2977_v52 = vld [vmem:[%s3279_s9 + $0x28] sm:$0xff]   ;;  %v2978_v53 = vld [vmem:[%s3279_s9 + $0x60] sm:$0xff]   ;;  %v620_v56 = vunpack.c.h.s8.bf16 %v594_v49  ;;  %v2981_v59 = vld [vmem:[%s3279_s9 + $0x18] sm:$0xff]  }
  0x64   : > { %2788 = vmatprep.subr.bf16.mxu1 %v2976_v32  ;;  %v596_v60 = vld [vmem:[%s3269_s28 + $0x50] sm:$0xff]  ;;  %v2985_v2 = vld [vmem:[%s3279_s9 + $0x8] sm:$0xff]  }
  0x65   : > { %2683 = vmatpush3.bf16.msra.mxu0 %v2967_v50  ;;  %v618_v50 = vunpack.c.l.s8.bf16 %v594_v49  ;;  %v2983_v62 = vld [vmem:[%s3279_s9 + $0x10] sm:$0xff]  }
  0x66   : > { %2684 = vmatprep.subr.bf16.mxu0 %v2968_v51  ;;  %v621_v51 = vunpack.c.h.s8.bf16 %v595_v46  ;;  %2789 = vmatpush3.bf16.msra.mxu1 %v2977_v52 }
  0x67   : > { %1106 = vperm.xlu0 %2954, %v1032_v1   ;;  %1111 = vperm.xlu1 %2955, %v1033_v3   ;;  %v2984_v1 = vld [vmem:[%s3279_s9 + $0x48] sm:$0xff]   ;;  %v2986_v3 = vld [vmem:[%s3279_s9 + $0x40] sm:$0xff]  }
  0x68   : > { %2790 = vmatprep.subr.bf16.mxu1 %v2978_v53 }
  0x69   : > { %2685 = vmatpush3.bf16.msra.mxu0 %v2969_v54  ;;  %v597_v54 = vld [vmem:[%s3269_s28 + $0x58] sm:$0xff] }
  0x6a   : > { %2686 = vmatprep.subr.bf16.mxu0 %v2970_v55  ;;  %v2979_v55 = vld [vmem:[%s3279_s9 + $0x20] sm:$0xff]   ;;  %v623_v57 = vunpack.c.l.s8.bf16 %v597_v54  ;;  %v625_v0 = vunpack.c.h.s8.bf16 %v597_v54 }
  0x6b   : > { %1116 = vperm.xlu0 %2954, %v1034_v4   ;;  %1121 = vperm.xlu1 %2955, %v1035_v7   ;;  %v599_v4 = vld [vmem:[%s3269_s28 + $0x68] sm:$0xff] }
  0x6c   : > { %2791 = vmatpush3.bf16.msra.mxu1 %v2979_v55  ;;  %v627_v7 = vunpack.c.l.s8.bf16 %v599_v4 }
  0x6d   : > { %2687 = vmatpush3.bf16.msra.mxu0 %v2971_v58  ;;  %v2980_v58 = vld [vmem:[%s3279_s9 + $0x58] sm:$0xff]  }
  0x6e   : > { %2792 = vmatprep.subr.bf16.mxu1 %v2980_v58 }
  0x6f   : > { %1126 = vperm.xlu0 %2954, %v1036_v8   ;;  %1131 = vperm.xlu1 %2955, %v1037_v10   ;;  %v598_v8 = vld [vmem:[%s3269_s28 + $0x60] sm:$0xff]  ;;  %v629_v10 = vunpack.c.h.s8.bf16 %v599_v4 }
  0x70   : > { %795 = vmatmul.mubr.bf16.vlgmr.msra.gmra.mxu0 %v602_v61  ;;  %2793 = vmatpush3.bf16.msra.mxu1 %v2981_v59  ;;  %v2982_v61 = vld [vmem:[%s3279_s9 + $0x50] sm:$0xff]   ;;  %v626_v9 = vunpack.c.l.s8.bf16 %v598_v8 }
  0x71   : > { %802 = vmatprep.mubr.bf16.mxu0 %v605_v63  ;;  %2794 = vmatprep.subr.bf16.mxu1 %v2982_v61  ;;  %v622_v63 = vunpack.c.l.s8.bf16 %v596_v60  ;;  %v2991_v61 = vld [vmem:[#allocation2 + $0x14] ss:$8 sps:$4 sm:$0xff]  }
  0x73   : > { %1136 = vperm.xlu0 %2954, %v1038_v12   ;;  %1141 = vperm.xlu1 %2955, %v1039_v14   ;;  %v628_v12 = vunpack.c.h.s8.bf16 %v598_v8  ;;  %v600_v14 = vld [vmem:[%s3269_s28 + $0x70] sm:$0xff] }
  0x74   : > { %2795 = vmatpush3.bf16.msra.mxu1 %v2983_v62 }
  0x75   : > { %2796 = vmatprep.subr.bf16.mxu1 %v2984_v1 }
  0x77   : > { %1146 = vperm.xlu0 %2954, %v1040_v15   ;;  %1151 = vperm.xlu1 %2955, %v1041_v17   ;;  %v630_v15 = vunpack.c.l.s8.bf16 %v600_v14  ;;  %v632_v17 = vunpack.c.h.s8.bf16 %v600_v14 }
  0x78   : > { %803 = vmatmul.mubr.bf16.gmra.mxu0 %v604_v5  ;;  %2797 = vmatpush3.bf16.msra.mxu1 %v2985_v2  ;;  %v2987_v5 = vld [vmem:[%s3279_s9] sm:$0xff]  }
  0x79   : > { %810 = vmatprep.mubr.bf16.mxu0 %v607_v6  ;;  %2798 = vmatprep.subr.bf16.mxu1 %v2986_v3  ;;  %v624_v6 = vunpack.c.h.s8.bf16 %v596_v60 }
  0x7b   : > { %1156 = vperm.xlu0 %2954, %v1042_v19   ;;  %1161 = vperm.xlu1 %2955, %v1043_v22  }
  0x7c   : > { %2799 = vmatpush3.bf16.msra.mxu1 %v2987_v5 }
  0x7f   : > { %1166 = vperm.xlu0 %2954, %v1044_v23   ;;  %1171 = vperm.xlu1 %2955, %v1045_v27  }
  0x80   : > { %811 = vmatmul.mubr.bf16.gmra.mxu0 %v606_v11  ;;  %v601_v11 = vld [vmem:[%s3269_s28 + $0x78] sm:$0xff] }
  0x81   : > { %818 = vmatprep.mubr.bf16.mxu0 %v609_v13  ;;  %v631_v13 = vunpack.c.l.s8.bf16 %v601_v11  ;;  %v633_v16 = vunpack.c.h.s8.bf16 %v601_v11  ;;  %v2994_v11 = vld [vmem:[#allocation2 + $0x24] ss:$8 sps:$4 sm:$0xff]  }
  0x83   : > { %1176 = vperm.xlu0 %2954, %v1046_v29   ;;  %1181 = vperm.xlu1 %2955, %v1047_v33  }
  0x87   : > { %1186 = vperm.xlu0 %2954, %v1048_v34   ;;  %1191 = vperm.xlu1 %2955, %v1049_v36  }
  0x88   : > { %819 = vmatmul.mubr.bf16.gmra.mxu0 %v608_v18 }
  0x89   : > { %826 = vmatprep.mubr.bf16.mxu0 %v611_v20 }
  0x8b   : > { %1196 = vperm.xlu0 %2954, %v1050_v38   ;;  %1201 = vperm.xlu1 %2955, %v1051_v40  }
  0x8f   : > { %1206 = vperm.xlu0 %2954, %v1052_v41   ;;  %1211 = vperm.xlu1 %2955, %v1053_v43  }
  0x90   : > { %827 = vmatmul.mubr.bf16.gmra.mxu0 %v610_v28 }
  0x91   : > { %834 = vmatprep.mubr.bf16.mxu0 %v613_v30 }
  0x98   : > { %835 = vmatmul.mubr.bf16.gmra.mxu0 %v612_v37 }
  0x99   : > { %842 = vmatprep.mubr.bf16.mxu0 %v615_v39 }
  0xa0   : > { %843 = vmatmul.mubr.bf16.gmra.mxu0 %v614_v44 }
  0xa1   : > { %850 = vmatprep.mubr.bf16.mxu0 %v617_v45 }
  0xa8   : > { %851 = vmatmul.mubr.bf16.gmra.mxu0 %v616_v47 }
  0xa9   : > { %858 = vmatprep.mubr.bf16.mxu0 %v619_v48  ;;  %v2990_v48 = vld [vmem:[#allocation2 + $0x4] ss:$8 sps:$4 sm:$0xff]  }
  0xaa   : > { %1765 = vmatprep.mubr.bf16.mxu1 %v2990_v48 }
  0xb0   : > { %859 = vmatmul.mubr.bf16.gmra.mxu0 %v618_v50 }
  0xb1   : > { %866 = vmatprep.mubr.bf16.mxu0 %v621_v51 }
  0xb8   : > { %867 = vmatmul.mubr.bf16.gmra.mxu0 %v620_v56 }
  0xb9   : > { %874 = vmatprep.mubr.bf16.mxu0 %v623_v57 }
  0xc0   : > { %875 = vmatmul.mubr.bf16.gmra.mxu0 %v622_v63 }
  0xc1   : > { %882 = vmatprep.mubr.bf16.mxu0 %v625_v0 }
  0xc8   : > { %883 = vmatmul.mubr.bf16.gmra.mxu0 %v624_v6 }
  0xc9   : > { %890 = vmatprep.mubr.bf16.mxu0 %v627_v7 }
  0xce   : > { %v1057_v19 = vpop.permute.xlu0 %1056  ;;  %v1067_v30 = vpop.permute.xlu1 %1066 }
  0xd0   : > { %891 = vmatmul.mubr.bf16.gmra.mxu0 %v626_v9 }
  0xd1   : > { %898 = vmatprep.mubr.bf16.mxu0 %v629_v10 }
  0xd2   : > { %v1062_v27 = vpop.permute.xlu0 %1061  ;;  %v1072_v39 = vpop.permute.xlu1 %1071 }
  0xd6   : > { %v1077_v45 = vpop.permute.xlu0 %1076  ;;  %v1082_v53 = vpop.permute.xlu1 %1081 }
  0xd8   : > { %899 = vmatmul.mubr.bf16.gmra.mxu0 %v628_v12 }
  0xd9   : > { %906 = vmatprep.mubr.bf16.mxu0 %v631_v13 }
  0xda   : > { %v1087_v59 = vpop.permute.xlu0 %1086  ;;  %v1092_v3 = vpop.permute.xlu1 %1091 }
  0xde   : > { %v1097_v9 = vpop.permute.xlu0 %1096 }
  0xe0   : > { %907 = vmatmul.mubr.bf16.gmra.mxu0 %v630_v15 }
  0xe1   : > { %914 = vmatprep.mubr.bf16.mxu0 %v633_v16 }
  0xe8   : > { %915 = vmatmul.mubr.bf16.gmra.mxu0 %v632_v17  ;;  %v1102_v17 = vpop.permute.xlu1 %1101 }
 0x130   : > { %v2688_v18 = vpop.f32.mrf.mxu0 }
 0x132   : > { %v2689_v20 = vpop.f32.mrf.mxu0 }
 0x133   : > { %v2690_v21 = vadd.f32 %v2689_v20, %v2688_v18 }
 0x134   : > { %v2691_v22 = vpop.f32.mrf.mxu0 }
 0x135   : > { %v1214_v23 = vmul.f32 %v2690_v21, %v1057_v19 }
 0x136   : > { %v2692_v24 = vpop.f32.mrf.mxu0 }
 0x137   : > { %v2513_v25 = vpack.c.bf16 %v1214_v23, %v1214_v23  ;;  %v2693_v26 = vadd.f32 %v2692_v24, %v2691_v22  ;;  %v1107_v23 = vpop.permute.xlu0 %1106 }
 0x138   : > { %v2694_v28 = vpop.f32.mrf.mxu0 }
 0x139   : > { %1374 = vst [vmem:[#allocation2] sm:$0xf] %v2513_v25  ;;  %v1215_v29 = vmul.f32 %v2693_v26, %v1062_v27  ;;  %v2997_v25 = vld [vmem:[#allocation2 + $0x34] ss:$8 sps:$4 sm:$0xff]  }
 0x13a   : > { %v2695_v31 = vpop.f32.mrf.mxu0 }
 0x13b   : > { %v2514_v32 = vpack.c.bf16 %v1215_v29, %v1215_v29  ;;  %v2696_v33 = vadd.f32 %v2695_v31, %v2694_v28  ;;  %v1112_v31 = vpop.permute.xlu1 %1111 }
 0x13c   : > { %v2697_v34 = vpop.f32.mrf.mxu0 }
 0x13d   : > { %1375 = vst [vmem:[#allocation2 + $0x8] sm:$0xf] %v2514_v32  ;;  %v1216_v35 = vmul.f32 %v2696_v33, %v1067_v30 }
 0x13e   : > { %v2698_v36 = vpop.f32.mrf.mxu0 }
 0x13f   : > { %v2515_v37 = vpack.c.bf16 %v1216_v35, %v1216_v35  ;;  %v2699_v38 = vadd.f32 %v2698_v36, %v2697_v34 }
 0x140   : > { %v2700_v40 = vpop.f32.mrf.mxu0 }
 0x141   : > { %1376 = vst [vmem:[#allocation2 + $0x10] sm:$0xf] %v2515_v37  ;;  %v1217_v41 = vmul.f32 %v2699_v38, %v1072_v39  ;;  %v1117_v37 = vpop.permute.xlu0 %1116  ;;  %v3000_v39 = vld [vmem:[#allocation2 + $0x44] ss:$8 sps:$4 sm:$0xff]  }
 0x142   : > { %v2701_v42 = vpop.f32.mrf.mxu0 }
 0x143   : > { %v2516_v43 = vpack.c.bf16 %v1217_v41, %v1217_v41  ;;  %v2702_v44 = vadd.f32 %v2701_v42, %v2700_v40 }
 0x144   : > { %v2703_v46 = vpop.f32.mrf.mxu0  ;;  %v2988_v47 = vld [vmem:[#allocation2] ss:$8 sps:$4 sm:$0xff]  }
 0x145   : > { %1377 = vst [vmem:[#allocation2 + $0x18] sm:$0xf] %v2516_v43  ;;  %v1218_v49 = vmul.f32 %v2702_v44, %v1077_v45  ;;  %1766 = vmatmul.mubr.bf16.vlgmr.msra.gmra.mxu1 %v2988_v47  ;;  %v1122_v45 = vpop.permute.xlu1 %1121 }
 0x146   : > { %v2704_v50 = vpop.f32.mrf.mxu0  ;;  %1773 = vmatprep.mubr.bf16.mxu1 %v2991_v61 }
 0x147   : > { %v2517_v51 = vpack.c.bf16 %v1218_v49, %v1218_v49  ;;  %v2705_v52 = vadd.f32 %v2704_v50, %v2703_v46 }
 0x148   : > { %v2706_v54 = vpop.f32.mrf.mxu0 }
 0x149   : > { %1378 = vst [vmem:[#allocation2 + $0x20] sm:$0xf] %v2517_v51  ;;  %v1219_v55 = vmul.f32 %v2705_v52, %v1082_v53  ;;  %v1127_v51 = vpop.permute.xlu0 %1126  ;;  %v3003_v53 = vld [vmem:[#allocation2 + $0x54] ss:$8 sps:$4 sm:$0xff]  }
 0x14a   : > { %v2707_v56 = vpop.f32.mrf.mxu0 }
 0x14b   : > { %v2518_v57 = vpack.c.bf16 %v1219_v55, %v1219_v55  ;;  %v2708_v58 = vadd.f32 %v2707_v56, %v2706_v54 }
 0x14c   : > { %v2709_v60 = vpop.f32.mrf.mxu0  ;;  %v2993_v62 = vld [vmem:[#allocation2 + $0x10] ss:$8 sps:$4 sm:$0xff]  }
 0x14d   : > { %1379 = vst [vmem:[#allocation2 + $0x28] sm:$0xf] %v2518_v57  ;;  %v1220_v63 = vmul.f32 %v2708_v58, %v1087_v59  ;;  %1774 = vmatmul.mubr.bf16.gmra.mxu1 %v2993_v62  ;;  %v1132_v59 = vpop.permute.xlu1 %1131 }
 0x14e   : > { %v2710_v0 = vpop.f32.mrf.mxu0  ;;  %1781 = vmatprep.mubr.bf16.mxu1 %v2994_v11 }
 0x14f   : > { %v2519_v1 = vpack.c.bf16 %v1220_v63, %v1220_v63  ;;  %v2711_v2 = vadd.f32 %v2710_v0, %v2709_v60 }
 0x150   : > { %v2712_v4 = vpop.f32.mrf.mxu0 }
 0x151   : > { %1380 = vst [vmem:[#allocation2 + $0x30] sm:$0xf] %v2519_v1  ;;  %v1221_v5 = vmul.f32 %v2711_v2, %v1092_v3  ;;  %v1137_v1 = vpop.permute.xlu0 %1136  ;;  %v3006_v3 = vld [vmem:[#allocation2 + $0x64] ss:$8 sps:$4 sm:$0xff]  }
 0x152   : > { %v2713_v6 = vpop.f32.mrf.mxu0 }
 0x153   : > { %v2520_v7 = vpack.c.bf16 %v1221_v5, %v1221_v5  ;;  %v2714_v8 = vadd.f32 %v2713_v6, %v2712_v4 }
 0x154   : > { %v2715_v10 = vpop.f32.mrf.mxu0  ;;  %v2996_v12 = vld [vmem:[#allocation2 + $0x20] ss:$8 sps:$4 sm:$0xff]  }
 0x155   : > { %1381 = vst [vmem:[#allocation2 + $0x38] sm:$0xf] %v2520_v7  ;;  %v1222_v13 = vmul.f32 %v2714_v8, %v1097_v9  ;;  %1782 = vmatmul.mubr.bf16.gmra.mxu1 %v2996_v12  ;;  %v1142_v9 = vpop.permute.xlu1 %1141 }
 0x156   : > { %v2716_v14 = vpop.f32.mrf.mxu0  ;;  %1789 = vmatprep.mubr.bf16.mxu1 %v2997_v25 }
 0x157   : > { %v2521_v15 = vpack.c.bf16 %v1222_v13, %v1222_v13  ;;  %v2717_v16 = vadd.f32 %v2716_v14, %v2715_v10 }
 0x158   : > { %v2718_v18 = vpop.f32.mrf.mxu0 }
 0x159   : > { %1382 = vst [vmem:[#allocation2 + $0x40] sm:$0xf] %v2521_v15  ;;  %v1223_v19 = vmul.f32 %v2717_v16, %v1102_v17  ;;  %v1147_v15 = vpop.permute.xlu0 %1146  ;;  %v3009_v17 = vld [vmem:[#allocation2 + $0x74] ss:$8 sps:$4 sm:$0xff]  }
 0x15a   : > { %v2719_v20 = vpop.f32.mrf.mxu0 }
 0x15b   : > { %v2522_v21 = vpack.c.bf16 %v1223_v19, %v1223_v19  ;;  %v2720_v22 = vadd.f32 %v2719_v20, %v2718_v18 }
 0x15c   : > { %v2721_v24 = vpop.f32.mrf.mxu0  ;;  %v2999_v26 = vld [vmem:[#allocation2 + $0x30] ss:$8 sps:$4 sm:$0xff]  }
 0x15d   : > { %1383 = vst [vmem:[#allocation2 + $0x48] sm:$0xf] %v2522_v21  ;;  %v1224_v27 = vmul.f32 %v2720_v22, %v1107_v23  ;;  %1790 = vmatmul.mubr.bf16.gmra.mxu1 %v2999_v26  ;;  %v1152_v23 = vpop.permute.xlu1 %1151 }
 0x15e   : > { %v2722_v28 = vpop.f32.mrf.mxu0  ;;  %1797 = vmatprep.mubr.bf16.mxu1 %v3000_v39 }
 0x15f   : > { %v2523_v29 = vpack.c.bf16 %v1224_v27, %v1224_v27  ;;  %v2723_v30 = vadd.f32 %v2722_v28, %v2721_v24 }
 0x160   : > { %v2724_v32 = vpop.f32.mrf.mxu0 }
 0x161   : > { %1384 = vst [vmem:[#allocation2 + $0x50] sm:$0xf] %v2523_v29  ;;  %v1225_v33 = vmul.f32 %v2723_v30, %v1112_v31  ;;  %v1157_v29 = vpop.permute.xlu0 %1156  ;;  %v3012_v31 = vld [vmem:[#allocation2 + $0x84] ss:$8 sps:$4 sm:$0xff]  }
 0x162   : > { %v2725_v34 = vpop.f32.mrf.mxu0 }
 0x163   : > { %v2524_v35 = vpack.c.bf16 %v1225_v33, %v1225_v33  ;;  %v2726_v36 = vadd.f32 %v2725_v34, %v2724_v32 }
 0x164   : > { %v2727_v38 = vpop.f32.mrf.mxu0  ;;  %v3002_v40 = vld [vmem:[#allocation2 + $0x40] ss:$8 sps:$4 sm:$0xff]  }
 0x165   : > { %1385 = vst [vmem:[#allocation2 + $0x58] sm:$0xf] %v2524_v35  ;;  %v1226_v41 = vmul.f32 %v2726_v36, %v1117_v37  ;;  %1798 = vmatmul.mubr.bf16.gmra.mxu1 %v3002_v40  ;;  %v1162_v37 = vpop.permute.xlu1 %1161 }
 0x166   : > { %v2728_v42 = vpop.f32.mrf.mxu0  ;;  %1805 = vmatprep.mubr.bf16.mxu1 %v3003_v53 }
 0x167   : > { %v2525_v43 = vpack.c.bf16 %v1226_v41, %v1226_v41  ;;  %v2729_v44 = vadd.f32 %v2728_v42, %v2727_v38 }
 0x168   : > { %v2730_v46 = vpop.f32.mrf.mxu0 }
 0x169   : > { %1386 = vst [vmem:[#allocation2 + $0x60] sm:$0xf] %v2525_v43  ;;  %v1227_v47 = vmul.f32 %v2729_v44, %v1122_v45  ;;  %v1167_v43 = vpop.permute.xlu0 %1166  ;;  %v3015_v45 = vld [vmem:[#allocation2 + $0x94] ss:$8 sps:$4 sm:$0xff]  }
 0x16a   : > { %v2731_v48 = vpop.f32.mrf.mxu0 }
 0x16b   : > { %v2526_v49 = vpack.c.bf16 %v1227_v47, %v1227_v47  ;;  %v2732_v50 = vadd.f32 %v2731_v48, %v2730_v46 }
 0x16c   : > { %v2733_v52 = vpop.f32.mrf.mxu0  ;;  %v3005_v54 = vld [vmem:[#allocation2 + $0x50] ss:$8 sps:$4 sm:$0xff]  }
 0x16d   : > { %1387 = vst [vmem:[#allocation2 + $0x68] sm:$0xf] %v2526_v49  ;;  %v1228_v55 = vmul.f32 %v2732_v50, %v1127_v51  ;;  %1806 = vmatmul.mubr.bf16.gmra.mxu1 %v3005_v54  ;;  %v1172_v51 = vpop.permute.xlu1 %1171 }
 0x16e   : > { %v2734_v56 = vpop.f32.mrf.mxu0  ;;  %1813 = vmatprep.mubr.bf16.mxu1 %v3006_v3 }
 0x16f   : > { %v2527_v57 = vpack.c.bf16 %v1228_v55, %v1228_v55  ;;  %v2735_v58 = vadd.f32 %v2734_v56, %v2733_v52 }
 0x170   : > { %v2736_v60 = vpop.f32.mrf.mxu0 }
 0x171   : > { %1388 = vst [vmem:[#allocation2 + $0x70] sm:$0xf] %v2527_v57  ;;  %v1229_v61 = vmul.f32 %v2735_v58, %v1132_v59  ;;  %v1177_v57 = vpop.permute.xlu0 %1176  ;;  %v3018_v59 = vld [vmem:[#allocation2 + $0xa4] ss:$8 sps:$4 sm:$0xff]  }
 0x172   : > { %v2737_v62 = vpop.f32.mrf.mxu0 }
 0x173   : > { %v2528_v63 = vpack.c.bf16 %v1229_v61, %v1229_v61  ;;  %v2738_v0 = vadd.f32 %v2737_v62, %v2736_v60 }
 0x174   : > { %v2739_v2 = vpop.f32.mrf.mxu0  ;;  %v3008_v4 = vld [vmem:[#allocation2 + $0x60] ss:$8 sps:$4 sm:$0xff]  }
 0x175   : > { %1389 = vst [vmem:[#allocation2 + $0x78] sm:$0xf] %v2528_v63  ;;  %v1230_v5 = vmul.f32 %v2738_v0, %v1137_v1  ;;  %1814 = vmatmul.mubr.bf16.gmra.mxu1 %v3008_v4  ;;  %v1182_v1 = vpop.permute.xlu1 %1181 }
 0x176   : > { %v2740_v6 = vpop.f32.mrf.mxu0  ;;  %1821 = vmatprep.mubr.bf16.mxu1 %v3009_v17 }
 0x177   : > { %v2529_v7 = vpack.c.bf16 %v1230_v5, %v1230_v5  ;;  %v2741_v8 = vadd.f32 %v2740_v6, %v2739_v2 }
 0x178   : > { %v2742_v10 = vpop.f32.mrf.mxu0 }
 0x179   : > { %1390 = vst [vmem:[#allocation2 + $0x80] sm:$0xf] %v2529_v7  ;;  %v1231_v11 = vmul.f32 %v2741_v8, %v1142_v9  ;;  %v1187_v7 = vpop.permute.xlu0 %1186  ;;  %v3021_v9 = vld [vmem:[#allocation2 + $0xb4] ss:$8 sps:$4 sm:$0xff]  }
 0x17a   : > { %v2743_v12 = vpop.f32.mrf.mxu0 }
 0x17b   : > { %v2530_v13 = vpack.c.bf16 %v1231_v11, %v1231_v11  ;;  %v2744_v14 = vadd.f32 %v2743_v12, %v2742_v10 }
 0x17c   : > { %v2745_v16 = vpop.f32.mrf.mxu0  ;;  %v3011_v18 = vld [vmem:[#allocation2 + $0x70] ss:$8 sps:$4 sm:$0xff]  }
 0x17d   : > { %1391 = vst [vmem:[#allocation2 + $0x88] sm:$0xf] %v2530_v13  ;;  %v1232_v19 = vmul.f32 %v2744_v14, %v1147_v15  ;;  %1822 = vmatmul.mubr.bf16.gmra.mxu1 %v3011_v18  ;;  %v1192_v15 = vpop.permute.xlu1 %1191 }
 0x17e   : > { %v2746_v20 = vpop.f32.mrf.mxu0  ;;  %1829 = vmatprep.mubr.bf16.mxu1 %v3012_v31 }
 0x17f   : > { %v2531_v21 = vpack.c.bf16 %v1232_v19, %v1232_v19  ;;  %v2747_v22 = vadd.f32 %v2746_v20, %v2745_v16 }
 0x180   : > { %v2748_v24 = vpop.f32.mrf.mxu0 }
 0x181   : > { %1392 = vst [vmem:[#allocation2 + $0x90] sm:$0xf] %v2531_v21  ;;  %v1233_v25 = vmul.f32 %v2747_v22, %v1152_v23  ;;  %v1197_v21 = vpop.permute.xlu0 %1196  ;;  %v3024_v23 = vld [vmem:[#allocation2 + $0xc4] ss:$8 sps:$4 sm:$0xff]  }
 0x182   : > { %v2749_v26 = vpop.f32.mrf.mxu0 }
 0x183   : > { %v2532_v27 = vpack.c.bf16 %v1233_v25, %v1233_v25  ;;  %v2750_v28 = vadd.f32 %v2749_v26, %v2748_v24 }
 0x184   : > { %v2751_v30 = vpop.f32.mrf.mxu0  ;;  %v3014_v32 = vld [vmem:[#allocation2 + $0x80] ss:$8 sps:$4 sm:$0xff]  }
 0x185   : > { %1393 = vst [vmem:[#allocation2 + $0x98] sm:$0xf] %v2532_v27  ;;  %v1234_v33 = vmul.f32 %v2750_v28, %v1157_v29  ;;  %1830 = vmatmul.mubr.bf16.gmra.mxu1 %v3014_v32  ;;  %v1202_v29 = vpop.permute.xlu1 %1201 }
 0x186   : > { %v2752_v34 = vpop.f32.mrf.mxu0  ;;  %1837 = vmatprep.mubr.bf16.mxu1 %v3015_v45 }
 0x187   : > { %v2533_v35 = vpack.c.bf16 %v1234_v33, %v1234_v33  ;;  %v2753_v36 = vadd.f32 %v2752_v34, %v2751_v30 }
 0x188   : > { %v2754_v38 = vpop.f32.mrf.mxu0 }
 0x189   : > { %1394 = vst [vmem:[#allocation2 + $0xa0] sm:$0xf] %v2533_v35  ;;  %v1235_v39 = vmul.f32 %v2753_v36, %v1162_v37  ;;  %v1207_v35 = vpop.permute.xlu0 %1206  ;;  %v3027_v37 = vld [vmem:[#allocation2 + $0xd4] ss:$8 sps:$4 sm:$0xff]  }
 0x18a   : > { %v2755_v40 = vpop.f32.mrf.mxu0 }
 0x18b   : > { %v2534_v41 = vpack.c.bf16 %v1235_v39, %v1235_v39  ;;  %v2756_v42 = vadd.f32 %v2755_v40, %v2754_v38 }
 0x18c   : > { %v2757_v44 = vpop.f32.mrf.mxu0  ;;  %v3017_v46 = vld [vmem:[#allocation2 + $0x90] ss:$8 sps:$4 sm:$0xff]  }
 0x18d   : > { %1395 = vst [vmem:[#allocation2 + $0xa8] sm:$0xf] %v2534_v41  ;;  %v1236_v47 = vmul.f32 %v2756_v42, %v1167_v43  ;;  %1838 = vmatmul.mubr.bf16.gmra.mxu1 %v3017_v46  ;;  %v1212_v43 = vpop.permute.xlu1 %1211  ;;  %v3030_v46 = vld [vmem:[#allocation2 + $0xe4] ss:$8 sps:$4 sm:$0xff]  }
 0x18e   : > { %v2758_v48 = vpop.f32.mrf.mxu0  ;;  %1845 = vmatprep.mubr.bf16.mxu1 %v3018_v59 }
 0x18f   : > { %v2535_v49 = vpack.c.bf16 %v1236_v47, %v1236_v47  ;;  %v2759_v50 = vadd.f32 %v2758_v48, %v2757_v44  ;;  %v3033_v48 = vld [vmem:[#allocation2 + $0xf4] ss:$8 sps:$4 sm:$0xff]  }
 0x190   : > { %v2760_v52 = vpop.f32.mrf.mxu0 }
 0x191   : > { %1396 = vst [vmem:[#allocation2 + $0xb0] sm:$0xf] %v2535_v49  ;;  %v1237_v53 = vmul.f32 %v2759_v50, %v1172_v51  ;;  %v3354_v51 = vld [vmem:[%s414_s12] ss:$0 sm:$0xff] }
 0x192   : > { %v2761_v54 = vpop.f32.mrf.mxu0 }
 0x193   : > { %v2536_v55 = vpack.c.bf16 %v1237_v53, %v1237_v53  ;;  %v2762_v56 = vadd.f32 %v2761_v54, %v2760_v52 }
 0x194   : > { %v2763_v58 = vpop.f32.mrf.mxu0  ;;  %v3020_v60 = vld [vmem:[#allocation2 + $0xa0] ss:$8 sps:$4 sm:$0xff]  }
 0x195   : > { %1397 = vst [vmem:[#allocation2 + $0xb8] sm:$0xf] %v2536_v55  ;;  %v1238_v61 = vmul.f32 %v2762_v56, %v1177_v57  ;;  %1846 = vmatmul.mubr.bf16.gmra.mxu1 %v3020_v60  ;;  %v1894_v56 = vld [vmem:[#allocation4 + $0xb0] sm:$0xff] }
 0x196   : > { %v2764_v62 = vpop.f32.mrf.mxu0  ;;  %1853 = vmatprep.mubr.bf16.mxu1 %v3021_v9 }
 0x197   : > { %v2537_v63 = vpack.c.bf16 %v1238_v61, %v1238_v61  ;;  %v2765_v0 = vadd.f32 %v2764_v62, %v2763_v58 }
 0x198   : > { %v2766_v2 = vpop.f32.mrf.mxu0 }
 0x199   : > { %1398 = vst [vmem:[#allocation2 + $0xc0] sm:$0xf] %v2537_v63  ;;  %v1239_v3 = vmul.f32 %v2765_v0, %v1182_v1  ;;  %v1895_v63 = vld [vmem:[#allocation4] sm:$0xff] }
 0x19a   : > { %v2767_v4 = vpop.f32.mrf.mxu0 }
 0x19b   : > { %v2538_v5 = vpack.c.bf16 %v1239_v3, %v1239_v3  ;;  %v2768_v6 = vadd.f32 %v2767_v4, %v2766_v2 }
 0x19c   : > { %v2769_v8 = vpop.f32.mrf.mxu0  ;;  %v3023_v10 = vld [vmem:[#allocation2 + $0xb0] ss:$8 sps:$4 sm:$0xff]  }
 0x19d   : > { %1399 = vst [vmem:[#allocation2 + $0xc8] sm:$0xf] %v2538_v5  ;;  %v1240_v11 = vmul.f32 %v2768_v6, %v1187_v7  ;;  %1854 = vmatmul.mubr.bf16.gmra.mxu1 %v3023_v10  ;;  %v1896_v6 = vld [vmem:[#allocation4 + $0xd8] sm:$0xff] }
 0x19e   : > { %v2770_v12 = vpop.f32.mrf.mxu0  ;;  %1861 = vmatprep.mubr.bf16.mxu1 %v3024_v23 }
 0x19f   : > { %v2539_v13 = vpack.c.bf16 %v1240_v11, %v1240_v11  ;;  %v2771_v14 = vadd.f32 %v2770_v12, %v2769_v8 }
 0x1a0   : > { %v2772_v16 = vpop.f32.mrf.mxu0 }
 0x1a1   : > { %1400 = vst [vmem:[#allocation2 + $0xd0] sm:$0xf] %v2539_v13  ;;  %v1241_v17 = vmul.f32 %v2771_v14, %v1192_v15  ;;  %v1897_v13 = vld [vmem:[#allocation4 + $0x18] sm:$0xff] }
 0x1a2   : > { %v2773_v18 = vpop.f32.mrf.mxu0 }
 0x1a3   : > { %v2540_v19 = vpack.c.bf16 %v1241_v17, %v1241_v17  ;;  %v2774_v20 = vadd.f32 %v2773_v18, %v2772_v16 }
 0x1a4   : > { %v2775_v22 = vpop.f32.mrf.mxu0  ;;  %v3026_v24 = vld [vmem:[#allocation2 + $0xc0] ss:$8 sps:$4 sm:$0xff]  }
 0x1a5   : > { %1401 = vst [vmem:[#allocation2 + $0xd8] sm:$0xf] %v2540_v19  ;;  %v1242_v25 = vmul.f32 %v2774_v20, %v1197_v21  ;;  %1862 = vmatmul.mubr.bf16.gmra.mxu1 %v3026_v24  ;;  %v1898_v20 = vld [vmem:[#allocation4 + $0x50] sm:$0xff] }
 0x1a6   : > { %v2776_v26 = vpop.f32.mrf.mxu0  ;;  %1869 = vmatprep.mubr.bf16.mxu1 %v3027_v37 }
 0x1a7   : > { %v2541_v27 = vpack.c.bf16 %v1242_v25, %v1242_v25  ;;  %v2777_v28 = vadd.f32 %v2776_v26, %v2775_v22 }
 0x1a8   : > { %v2778_v30 = vpop.f32.mrf.mxu0 }
 0x1a9   : > { %1402 = vst [vmem:[#allocation2 + $0xe0] sm:$0xf] %v2541_v27  ;;  %v1243_v31 = vmul.f32 %v2777_v28, %v1202_v29  ;;  %v1899_v27 = vld [vmem:[#allocation4 + $0x68] sm:$0xff] }
 0x1aa   : > { %v2779_v32 = vpop.f32.mrf.mxu0 }
 0x1ab   : > { %v2542_v33 = vpack.c.bf16 %v1243_v31, %v1243_v31  ;;  %v2780_v34 = vadd.f32 %v2779_v32, %v2778_v30 }
 0x1ac   : > { %v2781_v36 = vpop.f32.mrf.mxu0  ;;  %v3029_v38 = vld [vmem:[#allocation2 + $0xd0] ss:$8 sps:$4 sm:$0xff]  }
 0x1ad   : > { %1403 = vst [vmem:[#allocation2 + $0xe8] sm:$0xf] %v2542_v33  ;;  %v1244_v39 = vmul.f32 %v2780_v34, %v1207_v35  ;;  %1870 = vmatmul.mubr.bf16.gmra.mxu1 %v3029_v38  ;;  %v1900_v34 = vld [vmem:[#allocation4 + $0x30] sm:$0xff] }
 0x1ae   : > { %v2782_v40 = vpop.f32.mrf.mxu0  ;;  %1877 = vmatprep.mubr.bf16.mxu1 %v3030_v46 }
 0x1af   : > { %v2543_v41 = vpack.c.bf16 %v1244_v39, %v1244_v39  ;;  %v2783_v42 = vadd.f32 %v2782_v40, %v2781_v36 }
 0x1b1   : > { %1404 = vst [vmem:[#allocation2 + $0xf0] sm:$0xf] %v2543_v41  ;;  %v1245_v44 = vmul.f32 %v2783_v42, %v1212_v43  ;;  %v1901_v41 = vld [vmem:[#allocation4 + $0x48] sm:$0xff] }
 0x1b3   : > { %v2544_v45 = vpack.c.bf16 %v1245_v44, %v1245_v44 }
 0x1b4   : > { %v3032_v47 = vld [vmem:[#allocation2 + $0xe0] ss:$8 sps:$4 sm:$0xff]  }
 0x1b5   : > { %1405 = vst [vmem:[#allocation2 + $0xf8] sm:$0xf] %v2544_v45  ;;  %1878 = vmatmul.mubr.bf16.gmra.mxu1 %v3032_v47 }
 0x1b6   : > { %1885 = vmatprep.mubr.bf16.mxu1 %v3033_v48  ;;  %v1902_v48 = vld [vmem:[#allocation4 + $0x80] sm:$0xff] }
 0x1bc   : > { %v3035_v49 = vld [vmem:[#allocation2 + $0xf0] ss:$8 sps:$4 sm:$0xff]  }
 0x1bd   : > { %1886 = vmatmul.mubr.bf16.gmra.mxu1 %v3035_v49 }
 0x205   : > { %v2800_v50 = vpop.f32.mrf.mxu1 }
 0x207   : > { %v2801_v52 = vpop.f32.mrf.mxu1 }
 0x208   : > { %v2802_v53 = vadd.f32 %v2801_v52, %v2800_v50 }
 0x209   : > { %v2803_v54 = vpop.f32.mrf.mxu1 }
 0x20a   : > { %v1768_v55 = vadd.f32 %v2802_v53, %v3354_v51 }
 0x20b   : > { %v2804_v57 = vpop.f32.mrf.mxu1 }
 0x20c   : > { %v1926_v58 = vmax.f32 %v1768_v55, 0.0  ;;  %v2805_v59 = vadd.f32 %v2804_v57, %v2803_v54 }
 0x20d   : > { %v2806_v60 = vpop.f32.mrf.mxu1 }
 0x20e   : > { %v1958_v61 = vadd.f32 %v1926_v58, %v1894_v56  ;;  %v1771_v62 = vadd.f32 %v2805_v59, %v3354_v51  ;;  %v1903_v56 = vld [vmem:[#allocation4 + $0x88] sm:$0xff] }
 0x20f   : > { %v2807_v0 = vpop.f32.mrf.mxu1 }
 0x210   : > { %1990 = vst [vmem:[#allocation4 + $0xb0] sm:$0xff] %v1958_v61  ;;  %v1927_v1 = vmax.f32 %v1771_v62, 0.0  ;;  %v2808_v2 = vadd.f32 %v2807_v0, %v2806_v60 }
 0x211   : > { %v2809_v3 = vpop.f32.mrf.mxu1 }
 0x212   : > { %v1959_v4 = vadd.f32 %v1927_v1, %v1895_v63  ;;  %v1776_v5 = vadd.f32 %v2808_v2, %v3354_v51  ;;  %v1904_v63 = vld [vmem:[#allocation4 + $0xe8] sm:$0xff] }
 0x213   : > { %v2810_v7 = vpop.f32.mrf.mxu1 }
 0x214   : > { %1991 = vst [vmem:[#allocation4] sm:$0xff] %v1959_v4  ;;  %v1928_v8 = vmax.f32 %v1776_v5, 0.0  ;;  %v2811_v9 = vadd.f32 %v2810_v7, %v2809_v3 }
 0x215   : > { %v2812_v10 = vpop.f32.mrf.mxu1 }
 0x216   : > { %v1960_v11 = vadd.f32 %v1928_v8, %v1896_v6  ;;  %v1779_v12 = vadd.f32 %v2811_v9, %v3354_v51  ;;  %v1905_v6 = vld [vmem:[#allocation4 + $0xb8] sm:$0xff] }
 0x217   : > { %v2813_v14 = vpop.f32.mrf.mxu1 }
 0x218   : > { %1992 = vst [vmem:[#allocation4 + $0xd8] sm:$0xff] %v1960_v11  ;;  %v1929_v15 = vmax.f32 %v1779_v12, 0.0  ;;  %v2814_v16 = vadd.f32 %v2813_v14, %v2812_v10 }
 0x219   : > { %v2815_v17 = vpop.f32.mrf.mxu1 }
 0x21a   : > { %v1961_v18 = vadd.f32 %v1929_v15, %v1897_v13  ;;  %v1784_v19 = vadd.f32 %v2814_v16, %v3354_v51  ;;  %v1906_v13 = vld [vmem:[#allocation4 + $0x60] sm:$0xff] }
 0x21b   : > { %v2816_v21 = vpop.f32.mrf.mxu1 }
 0x21c   : > { %1993 = vst [vmem:[#allocation4 + $0x18] sm:$0xff] %v1961_v18  ;;  %v1930_v22 = vmax.f32 %v1784_v19, 0.0  ;;  %v2817_v23 = vadd.f32 %v2816_v21, %v2815_v17 }
 0x21d   : > { %v2818_v24 = vpop.f32.mrf.mxu1 }
 0x21e   : > { %v1962_v25 = vadd.f32 %v1930_v22, %v1898_v20  ;;  %v1787_v26 = vadd.f32 %v2817_v23, %v3354_v51  ;;  %v1907_v20 = vld [vmem:[#allocation4 + $0xf0] sm:$0xff] }
 0x21f   : > { %v2819_v28 = vpop.f32.mrf.mxu1 }
 0x220   : > { %1994 = vst [vmem:[#allocation4 + $0x50] sm:$0xff] %v1962_v25  ;;  %v1931_v29 = vmax.f32 %v1787_v26, 0.0  ;;  %v2820_v30 = vadd.f32 %v2819_v28, %v2818_v24 }
 0x221   : > { %v2821_v31 = vpop.f32.mrf.mxu1 }
 0x222   : > { %v1963_v32 = vadd.f32 %v1931_v29, %v1899_v27  ;;  %v1792_v33 = vadd.f32 %v2820_v30, %v3354_v51  ;;  %v1908_v27 = vld [vmem:[#allocation4 + $0x8] sm:$0xff] }
 0x223   : > { %v2822_v35 = vpop.f32.mrf.mxu1 }
 0x224   : > { %1995 = vst [vmem:[#allocation4 + $0x68] sm:$0xff] %v1963_v32  ;;  %v1932_v36 = vmax.f32 %v1792_v33, 0.0  ;;  %v2823_v37 = vadd.f32 %v2822_v35, %v2821_v31 }
 0x225   : > { %v2824_v38 = vpop.f32.mrf.mxu1 }
 0x226   : > { %v1964_v39 = vadd.f32 %v1932_v36, %v1900_v34  ;;  %v1795_v40 = vadd.f32 %v2823_v37, %v3354_v51  ;;  %v1909_v34 = vld [vmem:[#allocation4 + $0x78] sm:$0xff] }
 0x227   : > { %v2825_v42 = vpop.f32.mrf.mxu1 }
 0x228   : > { %1996 = vst [vmem:[#allocation4 + $0x30] sm:$0xff] %v1964_v39  ;;  %v1933_v43 = vmax.f32 %v1795_v40, 0.0  ;;  %v2826_v44 = vadd.f32 %v2825_v42, %v2824_v38 }
 0x229   : > { %v2827_v45 = vpop.f32.mrf.mxu1 }
 0x22a   : > { %v1965_v46 = vadd.f32 %v1933_v43, %v1901_v41  ;;  %v1800_v47 = vadd.f32 %v2826_v44, %v3354_v51  ;;  %v1910_v41 = vld [vmem:[#allocation4 + $0x38] sm:$0xff] }
 0x22b   : > { %v2828_v49 = vpop.f32.mrf.mxu1 }
 0x22c   : > { %1997 = vst [vmem:[#allocation4 + $0x48] sm:$0xff] %v1965_v46  ;;  %v1934_v50 = vmax.f32 %v1800_v47, 0.0  ;;  %v2829_v52 = vadd.f32 %v2828_v49, %v2827_v45 }
 0x22d   : > { %v2830_v53 = vpop.f32.mrf.mxu1 }
 0x22e   : > { %v1966_v54 = vadd.f32 %v1934_v50, %v1902_v48  ;;  %v1803_v55 = vadd.f32 %v2829_v52, %v3354_v51  ;;  %v1911_v48 = vld [vmem:[#allocation4 + $0x58] sm:$0xff] }
 0x22f   : > { %v2831_v57 = vpop.f32.mrf.mxu1 }
 0x230   : > { %1998 = vst [vmem:[#allocation4 + $0x80] sm:$0xff] %v1966_v54  ;;  %v1935_v58 = vmax.f32 %v1803_v55, 0.0  ;;  %v2832_v59 = vadd.f32 %v2831_v57, %v2830_v53 }
 0x231   : > { %v2833_v60 = vpop.f32.mrf.mxu1 }
 0x232   : > { %v1967_v61 = vadd.f32 %v1935_v58, %v1903_v56  ;;  %v1808_v62 = vadd.f32 %v2832_v59, %v3354_v51  ;;  %v1912_v56 = vld [vmem:[#allocation4 + $0x40] sm:$0xff] }
 0x233   : > { %v2834_v0 = vpop.f32.mrf.mxu1 }
 0x234   : > { %1999 = vst [vmem:[#allocation4 + $0x88] sm:$0xff] %v1967_v61  ;;  %v1936_v1 = vmax.f32 %v1808_v62, 0.0  ;;  %v2835_v2 = vadd.f32 %v2834_v0, %v2833_v60 }
 0x235   : > { %v2836_v3 = vpop.f32.mrf.mxu1 }
 0x236   : > { %v1968_v4 = vadd.f32 %v1936_v1, %v1904_v63  ;;  %v1811_v5 = vadd.f32 %v2835_v2, %v3354_v51  ;;  %v1913_v63 = vld [vmem:[#allocation4 + $0xc8] sm:$0xff] }
 0x237   : > { %v2837_v7 = vpop.f32.mrf.mxu1 }
 0x238   : > { %2000 = vst [vmem:[#allocation4 + $0xe8] sm:$0xff] %v1968_v4  ;;  %v1937_v8 = vmax.f32 %v1811_v5, 0.0  ;;  %v2838_v9 = vadd.f32 %v2837_v7, %v2836_v3 }
 0x239   : > { %v2839_v10 = vpop.f32.mrf.mxu1 }
 0x23a   : > { %v1969_v11 = vadd.f32 %v1937_v8, %v1905_v6  ;;  %v1816_v12 = vadd.f32 %v2838_v9, %v3354_v51  ;;  %v1914_v6 = vld [vmem:[#allocation4 + $0xe0] sm:$0xff] }
 0x23b   : > { %v2840_v14 = vpop.f32.mrf.mxu1 }
 0x23c   : > { %2001 = vst [vmem:[#allocation4 + $0xb8] sm:$0xff] %v1969_v11  ;;  %v1938_v15 = vmax.f32 %v1816_v12, 0.0  ;;  %v2841_v16 = vadd.f32 %v2840_v14, %v2839_v10 }
 0x23d   : > { %v2842_v17 = vpop.f32.mrf.mxu1 }
 0x23e   : > { %v1970_v18 = vadd.f32 %v1938_v15, %v1906_v13  ;;  %v1819_v19 = vadd.f32 %v2841_v16, %v3354_v51  ;;  %v1915_v13 = vld [vmem:[#allocation4 + $0x90] sm:$0xff] }
 0x23f   : > { %v2843_v21 = vpop.f32.mrf.mxu1 }
 0x240   : > { %2002 = vst [vmem:[#allocation4 + $0x60] sm:$0xff] %v1970_v18  ;;  %v1939_v22 = vmax.f32 %v1819_v19, 0.0  ;;  %v2844_v23 = vadd.f32 %v2843_v21, %v2842_v17 }
 0x241   : > { %v2845_v24 = vpop.f32.mrf.mxu1 }
 0x242   : > { %v1971_v25 = vadd.f32 %v1939_v22, %v1907_v20  ;;  %v1824_v26 = vadd.f32 %v2844_v23, %v3354_v51  ;;  %v1916_v20 = vld [vmem:[#allocation4 + $0x70] sm:$0xff] }
 0x243   : > { %v2846_v28 = vpop.f32.mrf.mxu1 }
 0x244   : > { %2003 = vst [vmem:[#allocation4 + $0xf0] sm:$0xff] %v1971_v25  ;;  %v1940_v29 = vmax.f32 %v1824_v26, 0.0  ;;  %v2847_v30 = vadd.f32 %v2846_v28, %v2845_v24 }
 0x245   : > { %v2848_v31 = vpop.f32.mrf.mxu1 }
 0x246   : > { %v1972_v32 = vadd.f32 %v1940_v29, %v1908_v27  ;;  %v1827_v33 = vadd.f32 %v2847_v30, %v3354_v51  ;;  %v1917_v27 = vld [vmem:[#allocation4 + $0xc0] sm:$0xff] }
 0x247   : > { %v2849_v35 = vpop.f32.mrf.mxu1 }
 0x248   : > { %2004 = vst [vmem:[#allocation4 + $0x8] sm:$0xff] %v1972_v32  ;;  %v1941_v36 = vmax.f32 %v1827_v33, 0.0  ;;  %v2850_v37 = vadd.f32 %v2849_v35, %v2848_v31 }
 0x249   : > { %v2851_v38 = vpop.f32.mrf.mxu1 }
 0x24a   : > { %v1973_v39 = vadd.f32 %v1941_v36, %v1909_v34  ;;  %v1832_v40 = vadd.f32 %v2850_v37, %v3354_v51  ;;  %v1918_v34 = vld [vmem:[#allocation4 + $0xa8] sm:$0xff] }
 0x24b   : > { %v2852_v42 = vpop.f32.mrf.mxu1 }
 0x24c   : > { %2005 = vst [vmem:[#allocation4 + $0x78] sm:$0xff] %v1973_v39  ;;  %v1942_v43 = vmax.f32 %v1832_v40, 0.0  ;;  %v2853_v44 = vadd.f32 %v2852_v42, %v2851_v38 }
 0x24d   : > { %v2854_v45 = vpop.f32.mrf.mxu1 }
 0x24e   : > { %v1974_v46 = vadd.f32 %v1942_v43, %v1910_v41  ;;  %v1835_v47 = vadd.f32 %v2853_v44, %v3354_v51  ;;  %v1919_v41 = vld [vmem:[#allocation4 + $0xd0] sm:$0xff] }
 0x24f   : > { %v2855_v49 = vpop.f32.mrf.mxu1 }
 0x250   : > { %2006 = vst [vmem:[#allocation4 + $0x38] sm:$0xff] %v1974_v46  ;;  %v1943_v50 = vmax.f32 %v1835_v47, 0.0  ;;  %v2856_v52 = vadd.f32 %v2855_v49, %v2854_v45 }
 0x251   : > { %v2857_v53 = vpop.f32.mrf.mxu1 }
 0x252   : > { %v1975_v54 = vadd.f32 %v1943_v50, %v1911_v48  ;;  %v1840_v55 = vadd.f32 %v2856_v52, %v3354_v51  ;;  %v1920_v48 = vld [vmem:[#allocation4 + $0x10] sm:$0xff] }
 0x253   : > { %v2858_v57 = vpop.f32.mrf.mxu1 }
 0x254   : > { %2007 = vst [vmem:[#allocation4 + $0x58] sm:$0xff] %v1975_v54  ;;  %v1944_v58 = vmax.f32 %v1840_v55, 0.0  ;;  %v2859_v59 = vadd.f32 %v2858_v57, %v2857_v53 }
 0x255   : > { %v2860_v60 = vpop.f32.mrf.mxu1 }
 0x256   : > { %v1976_v61 = vadd.f32 %v1944_v58, %v1912_v56  ;;  %v1843_v62 = vadd.f32 %v2859_v59, %v3354_v51  ;;  %v1921_v56 = vld [vmem:[#allocation4 + $0x28] sm:$0xff] }
 0x257   : > { %v2861_v0 = vpop.f32.mrf.mxu1 }
 0x258   : > { %2008 = vst [vmem:[#allocation4 + $0x40] sm:$0xff] %v1976_v61  ;;  %v1945_v1 = vmax.f32 %v1843_v62, 0.0  ;;  %v2862_v2 = vadd.f32 %v2861_v0, %v2860_v60 }
 0x259   : > { %v2863_v3 = vpop.f32.mrf.mxu1 }
 0x25a   : > { %v1977_v4 = vadd.f32 %v1945_v1, %v1913_v63  ;;  %v1848_v5 = vadd.f32 %v2862_v2, %v3354_v51  ;;  %v1922_v63 = vld [vmem:[#allocation4 + $0xa0] sm:$0xff] }
 0x25b   : > { %v2864_v7 = vpop.f32.mrf.mxu1 }
 0x25c   : > { %2009 = vst [vmem:[#allocation4 + $0xc8] sm:$0xff] %v1977_v4  ;;  %v1946_v8 = vmax.f32 %v1848_v5, 0.0  ;;  %v2865_v9 = vadd.f32 %v2864_v7, %v2863_v3 }
 0x25d   : > { %v2866_v10 = vpop.f32.mrf.mxu1 }
 0x25e   : > { %v1978_v11 = vadd.f32 %v1946_v8, %v1914_v6  ;;  %v1851_v12 = vadd.f32 %v2865_v9, %v3354_v51  ;;  %v1923_v6 = vld [vmem:[#allocation4 + $0xf8] sm:$0xff] }
 0x25f   : > { %v2867_v14 = vpop.f32.mrf.mxu1 }
 0x260   : > { %2010 = vst [vmem:[#allocation4 + $0xe0] sm:$0xff] %v1978_v11  ;;  %v1947_v15 = vmax.f32 %v1851_v12, 0.0  ;;  %v2868_v16 = vadd.f32 %v2867_v14, %v2866_v10 }
 0x261   : > { %v2869_v17 = vpop.f32.mrf.mxu1 }
 0x262   : > { %v1979_v18 = vadd.f32 %v1947_v15, %v1915_v13  ;;  %v1856_v19 = vadd.f32 %v2868_v16, %v3354_v51  ;;  %v1924_v13 = vld [vmem:[#allocation4 + $0x20] sm:$0xff] }
 0x263   : > { %v2870_v21 = vpop.f32.mrf.mxu1 }
 0x264   : > { %2011 = vst [vmem:[#allocation4 + $0x90] sm:$0xff] %v1979_v18  ;;  %v1948_v22 = vmax.f32 %v1856_v19, 0.0  ;;  %v2871_v23 = vadd.f32 %v2870_v21, %v2869_v17  ;;  %v1925_v19 = vld [vmem:[#allocation4 + $0x98] sm:$0xff] }
 0x265   : > { %v2872_v24 = vpop.f32.mrf.mxu1 }
 0x266   : > { %v1980_v25 = vadd.f32 %v1948_v22, %v1916_v20  ;;  %v1859_v26 = vadd.f32 %v2871_v23, %v3354_v51 }
 0x267   : > { %v2873_v28 = vpop.f32.mrf.mxu1 }
 0x268   : > { %2012 = vst [vmem:[#allocation4 + $0x70] sm:$0xff] %v1980_v25  ;;  %v1949_v29 = vmax.f32 %v1859_v26, 0.0  ;;  %v2874_v30 = vadd.f32 %v2873_v28, %v2872_v24 }
 0x269   : > { %v2875_v31 = vpop.f32.mrf.mxu1 }
 0x26a   : > { %v1981_v32 = vadd.f32 %v1949_v29, %v1917_v27  ;;  %v1864_v33 = vadd.f32 %v2874_v30, %v3354_v51 }
 0x26b   : > { %v2876_v35 = vpop.f32.mrf.mxu1 }
 0x26c   : > { %2013 = vst [vmem:[#allocation4 + $0xc0] sm:$0xff] %v1981_v32  ;;  %v1950_v36 = vmax.f32 %v1864_v33, 0.0  ;;  %v2877_v37 = vadd.f32 %v2876_v35, %v2875_v31 }
 0x26d   : > { %v2878_v38 = vpop.f32.mrf.mxu1 }
 0x26e   : > { %v1982_v39 = vadd.f32 %v1950_v36, %v1918_v34  ;;  %v1867_v40 = vadd.f32 %v2877_v37, %v3354_v51 }
 0x26f   : > { %v2879_v42 = vpop.f32.mrf.mxu1 }
 0x270   : > { %2014 = vst [vmem:[#allocation4 + $0xa8] sm:$0xff] %v1982_v39  ;;  %v1951_v43 = vmax.f32 %v1867_v40, 0.0  ;;  %v2880_v44 = vadd.f32 %v2879_v42, %v2878_v38 }
 0x271   : > { %v2881_v45 = vpop.f32.mrf.mxu1 }
 0x272   : > { %v1983_v46 = vadd.f32 %v1951_v43, %v1919_v41  ;;  %v1872_v47 = vadd.f32 %v2880_v44, %v3354_v51 }
 0x273   : > { %v2882_v49 = vpop.f32.mrf.mxu1 }
 0x274   : > { %2015 = vst [vmem:[#allocation4 + $0xd0] sm:$0xff] %v1983_v46  ;;  %v1952_v50 = vmax.f32 %v1872_v47, 0.0  ;;  %v2883_v52 = vadd.f32 %v2882_v49, %v2881_v45 }
 0x275   : > { %v2884_v53 = vpop.f32.mrf.mxu1 }
 0x276   : > { %v1984_v54 = vadd.f32 %v1952_v50, %v1920_v48  ;;  %v1875_v55 = vadd.f32 %v2883_v52, %v3354_v51 }
 0x277   : > { %v2885_v57 = vpop.f32.mrf.mxu1 }
 0x278   : > { %2016 = vst [vmem:[#allocation4 + $0x10] sm:$0xff] %v1984_v54  ;;  %v1953_v58 = vmax.f32 %v1875_v55, 0.0  ;;  %v2886_v59 = vadd.f32 %v2885_v57, %v2884_v53 }
 0x279   : > { %v2887_v60 = vpop.f32.mrf.mxu1 }
 0x27a   : > { %v1985_v61 = vadd.f32 %v1953_v58, %v1921_v56  ;;  %v1880_v62 = vadd.f32 %v2886_v59, %v3354_v51 }
 0x27b   : > { %v2888_v0 = vpop.f32.mrf.mxu1 }
 0x27c   : > { %2017 = vst [vmem:[#allocation4 + $0x28] sm:$0xff] %v1985_v61  ;;  %v1954_v1 = vmax.f32 %v1880_v62, 0.0  ;;  %v2889_v2 = vadd.f32 %v2888_v0, %v2887_v60 }
 0x27d   : > { %v2890_v3 = vpop.f32.mrf.mxu1 }
 0x27e   : > { %v1986_v4 = vadd.f32 %v1954_v1, %v1922_v63  ;;  %v1883_v5 = vadd.f32 %v2889_v2, %v3354_v51 }
 0x27f   : > { %v2891_v7 = vpop.f32.mrf.mxu1 }
 0x280   : > { %2018 = vst [vmem:[#allocation4 + $0xa0] sm:$0xff] %v1986_v4  ;;  %v1955_v8 = vmax.f32 %v1883_v5, 0.0  ;;  %v2892_v9 = vadd.f32 %v2891_v7, %v2890_v3 }
 0x281   : > { %v2893_v10 = vpop.f32.mrf.mxu1 }
 0x282   : > { %v1987_v11 = vadd.f32 %v1955_v8, %v1923_v6  ;;  %v1888_v12 = vadd.f32 %v2892_v9, %v3354_v51 }
 0x283   : > { %v2894_v14 = vpop.f32.mrf.mxu1 }
 0x284   : > { %2019 = vst [vmem:[#allocation4 + $0xf8] sm:$0xff] %v1987_v11  ;;  %v1956_v15 = vmax.f32 %v1888_v12, 0.0  ;;  %v2895_v16 = vadd.f32 %v2894_v14, %v2893_v10 }
 0x286   : > { %v1988_v17 = vadd.f32 %v1956_v15, %v1924_v13  ;;  %v1891_v18 = vadd.f32 %v2895_v16, %v3354_v51 }
 0x288   : > { %2020 = vst [vmem:[#allocation4 + $0x20] sm:$0xff] %v1988_v17  ;;  %v1957_v20 = vmax.f32 %v1891_v18, 0.0  ;;  %2025 = sbr.rel (%p2472_p3) target bundleno = 668 (0x29c), region = 68 }
 0x28a   : > { %v1989_v21 = vadd.f32 %v1957_v20, %v1925_v19 }
 0x28c   : > { %2021 = vst [vmem:[#allocation4 + $0x98] sm:$0xff] %v1989_v21 }
 0x28d   : > { %v2026_v22 = vld [vmem:[#allocation4 + $0xb0] sm:$0xff]  ;;  %v2027_v23 = vld [vmem:[#allocation4] sm:$0xff]  ;;  %v2028_v24 = vld [vmem:[#allocation4 + $0xd8] sm:$0xff] }
 0x28e   : > { %v2580_v25 = vpack.c.bf16 %v2027_v23, %v2026_v22  ;;  %v2029_v26 = vld [vmem:[#allocation4 + $0x18] sm:$0xff]  ;;  %v2030_v27 = vld [vmem:[#allocation4 + $0x50] sm:$0xff]  ;;  %v2031_v28 = vld [vmem:[#allocation4 + $0x68] sm:$0xff] }
 0x28f   : > { %v2585_v29 = vpack.c.bf16 %v2029_v26, %v2028_v24  ;;  %v2590_v30 = vpack.c.bf16 %v2031_v28, %v2030_v27  ;;  %v2032_v31 = vld [vmem:[#allocation4 + $0x30] sm:$0xff]  ;;  %v2033_v32 = vld [vmem:[#allocation4 + $0x48] sm:$0xff]  ;;  %v2034_v51 = vld [vmem:[#allocation4 + $0x80] sm:$0xff] }
 0x290   : > { %2581 = vst [vmem:[#allocation10] sm:$0xff] %v2580_v25   ;;  %v2595_v33 = vpack.c.bf16 %v2033_v32, %v2032_v31  ;;  %v2035_v34 = vld [vmem:[#allocation4 + $0x88] sm:$0xff]  ;;  %v2037_v36 = vld [vmem:[#allocation4 + $0xb8] sm:$0xff]  ;;  %v2038_v39 = vld [vmem:[#allocation4 + $0x60] sm:$0xff] }
 0x291   : > { %v2036_v35 = vld [vmem:[#allocation4 + $0xe8] sm:$0xff]  ;;  %2657 = vst [vmem:[#allocation10 + $0x8] sm:$0xff] %v2585_v29   ;;  %2658 = vst [vmem:[#allocation10 + $0x10] sm:$0xff] %v2590_v30   ;;  %v2600_v37 = vpack.c.bf16 %v2035_v34, %v2034_v51  ;;  %v2039_v40 = vld [vmem:[#allocation4 + $0xf0] sm:$0xff] }
 0x292   : > { %v2605_v38 = vpack.c.bf16 %v2037_v36, %v2036_v35  ;;  %v2040_v41 = vld [vmem:[#allocation4 + $0x8] sm:$0xff]  ;;  %2659 = vst [vmem:[#allocation10 + $0x18] sm:$0xff] %v2595_v33   ;;  %v2610_v42 = vpack.c.bf16 %v2039_v40, %v2038_v39  ;;  %v2041_v43 = vld [vmem:[#allocation4 + $0x78] sm:$0xff]  ;;  %v2044_v48 = vld [vmem:[#allocation4 + $0x40] sm:$0xff] }
 0x293   : > { %v2042_v44 = vld [vmem:[#allocation4 + $0x38] sm:$0xff]  ;;  %2660 = vst [vmem:[#allocation10 + $0x20] sm:$0xff] %v2600_v37   ;;  %v2615_v46 = vpack.c.bf16 %v2041_v43, %v2040_v41  ;;  %v2045_v49 = vld [vmem:[#allocation4 + $0xc8] sm:$0xff]  ;;  %v2046_v50 = vld [vmem:[#allocation4 + $0xe0] sm:$0xff] }
 0x294   : > { %v2043_v45 = vld [vmem:[#allocation4 + $0x58] sm:$0xff]  ;;  %2661 = vst [vmem:[#allocation10 + $0x28] sm:$0xff] %v2605_v38   ;;  %2662 = vst [vmem:[#allocation10 + $0x30] sm:$0xff] %v2610_v42   ;;  %v2625_v52 = vpack.c.bf16 %v2045_v49, %v2044_v48  ;;  %v2047_v53 = vld [vmem:[#allocation4 + $0x90] sm:$0xff] }
 0x295   : > { %v2620_v47 = vpack.c.bf16 %v2043_v45, %v2042_v44  ;;  %v2048_v54 = vld [vmem:[#allocation4 + $0x70] sm:$0xff]  ;;  %v2049_v55 = vld [vmem:[#allocation4 + $0xc0] sm:$0xff]  ;;  %2663 = vst [vmem:[#allocation10 + $0x38] sm:$0xff] %v2615_v46   ;;  %v2630_v56 = vpack.c.bf16 %v2047_v53, %v2046_v50  ;;  %v2050_v58 = vld [vmem:[#allocation4 + $0xa8] sm:$0xff] }
 0x296   : > { %v2635_v57 = vpack.c.bf16 %v2049_v55, %v2048_v54  ;;  %v2051_v59 = vld [vmem:[#allocation4 + $0xd0] sm:$0xff]  ;;  %2665 = vst [vmem:[#allocation10 + $0x48] sm:$0xff] %v2625_v52   ;;  %v2053_v62 = vld [vmem:[#allocation4 + $0x28] sm:$0xff]  ;;  %v2054_v63 = vld [vmem:[#allocation4 + $0xa0] sm:$0xff] }
 0x297   : > { %2664 = vst [vmem:[#allocation10 + $0x40] sm:$0xff] %v2620_v47   ;;  %v2052_v60 = vld [vmem:[#allocation4 + $0x10] sm:$0xff]  ;;  %v2640_v61 = vpack.c.bf16 %v2051_v59, %v2050_v58  ;;  %v2055_v0 = vld [vmem:[#allocation4 + $0xf8] sm:$0xff]  ;;  %2666 = vst [vmem:[#allocation10 + $0x50] sm:$0xff] %v2630_v56  }
 0x298   : > { %2667 = vst [vmem:[#allocation10 + $0x58] sm:$0xff] %v2635_v57   ;;  %v2645_v1 = vpack.c.bf16 %v2053_v62, %v2052_v60  ;;  %v2650_v2 = vpack.c.bf16 %v2055_v0, %v2054_v63  ;;  %v2056_v3 = vld [vmem:[#allocation4 + $0x20] sm:$0xff]  ;;  %v2057_v4 = vld [vmem:[#allocation4 + $0x98] sm:$0xff] }
 0x299   : > { %2668 = vst [vmem:[#allocation10 + $0x60] sm:$0xff] %v2640_v61   ;;  %v2655_v5 = vpack.c.bf16 %v2057_v4, %v2056_v3 }
 0x29a   : > { %2669 = vst [vmem:[#allocation10 + $0x68] sm:$0xff] %v2645_v1   ;;  %2670 = vst [vmem:[#allocation10 + $0x70] sm:$0xff] %v2650_v2  }
 0x29b   : > { %2671 = vst [vmem:[#allocation10 + $0x78] sm:$0xff] %v2655_v5  }
 0x29c PF: > { %p3391_p4 = scmp.eq.s32.totalorder %s2360_s24, 2  ;;  %s3154_s15 = smov [#allocation10]  }
 0x29d   : > { %s2227_s16 = sshll.u32 %s3154_s15, 4  ;;  %s2228_s16 = int_to_ptr.vmem [resolvable:$true] %s2227_s16 }
 0x29e   : > { %s3088_s17 = scalar_lea.vmem %s2228_s16, 2048  ;;  %p3095_p1 = scmp.lt.s32.totalorder %s2228_s16, %s2228_s16 }
 0x29f   : > { %p3089_p12 = scmp.ne.s32.totalorder %s2228_s16, %s3088_s17  ;;  %p3096_p2 = scmp.lt.s32.totalorder %s3088_s17, %s3088_s17 }
 0x2a1   : > { %p3090_p13 = pnand %p3089_p12, %p3391_p4  ;;  %p3097_p5 = por %p3096_p2, %p3095_p1 }
 0x2a3   : > { %p3091_p0 = pneg %p3090_p13 }
 0x2a5   : > { %p3098_p8 = pnand %p3097_p5, %p3091_p0 }
 0x2a7   : > { %3101 = shalt.err (!%p3098_p8)
}
 0x2a8   : > { %s3155_s18 = smov 64   ;;  %s3156_s24 = smov 4  }
 0x2a9   : > { %2905 = dma.vmem_to_hbm [thread:$0]  (%p3391_p4), %s2228_s16, 2048, %s3421_s6, [#allocation7], %s3155_s18, %s3155_s18, %s3156_s24  }
 0x2aa   : > { %3133 = dma.done.wait (%p3391_p4), [#allocation7], 2048  }
 0x2ab   : > { %3135 = vsyncadd (%p3391_p4), [#allocation7], 4294965248 }
 0x2ac PF: > { %s19_s23 = sadd.s32 1, %s3146_s23   ;;  %s3426_s21 = smov %s3142_s22 }
 0x2ad   : > { %p16_p9 = scmp.ge.s32.totalorder %s19_s23, 5   ;;  %s3427_s22 = smov %s3429_s25 }
 0x2af   :  { %18 = sbr.rel (!%p16_p9) target bundleno = 4 (0x4), region = 108 }
 0x2b4   :  { %2243 = vsyncpa [#allocation6], 1 }
 0x2b5   :  { %2245 = vsyncpa [#allocation6 + $0x1], 1 }
 0x2b6   :  { %2246 = vsyncpa [#allocation9], 1 }
 0x2b7   :  { %2247 = vsyncpa [#allocation7], 1 }
 0x2b8   :  { %2249 = vsyncpa [#allocation7 + $0x1], 1 }

</bundles_post_ra>
